<compile_context>
chip_gen: v5e
topology: v5e:2x2
jax: 0.10.0
libtpu: 0.0.40
codegen_flags: <defaults>
</compile_context>

<pallas_src>
import functools
import math

import jax
import jax.numpy as jnp
from jax.experimental import pallas as pl
from jax.experimental.pallas import tpu as pltpu  # noqa: F401  (kept for TPU-targeted builds)

# ----------------------------- configuration --------------------------------
BATCH = 2
IMG_C, IMG_H, IMG_W = 3, 32, 32
HIDDEN = 32                       # transformer.d_model
NUM_QUERIES = 12
NUM_CLASSES = 7
NUM_VERB_CLASSES = 5
NUM_DEC_LAYERS = 3                # transformer.decoder.num_layers -> num_pred
NUM_FEATURE_LEVELS = 2
BACKBONE_CHANNELS = (8, 16)       # backbone.num_channels
BACKBONE_STRIDES = (4, 8)         # image 32x32 -> 8x8 and 4x4 feature maps
GN_GROUPS = 32                    # nn.GroupNorm(32, hidden_dim)
GN_EPS = 1e-5
INV_SIG_EPS = 1e-5

OUT_W = 128                       # lane-dense output slab width for pred heads
BOX_LO = NUM_CLASSES + NUM_VERB_CLASSES      # box columns start (12)
BOX_HI = BOX_LO + 3 * 4                      # box columns end   (24)
assert BOX_HI <= OUT_W

# GroupNorm(32, 32): channels-per-group == 1, so per-group stats degenerate to
# per-channel stats and no group pooling is needed in the kernel.
# TODO(synk): a cpg > 1 config (e.g. hidden_dim=256) would need per-group
#             pooling of the channel statistics.
assert HIDDEN == GN_GROUPS


# ------------------ Pallas kernel: input_proj (1x1 conv + GN) ----------------
def _input_proj_gn_kernel(*refs, n_levels, batch, eps):
  """Fused over feature levels (static unroll), single grid-less step.

  refs layout: [xT_0, wT_0, b_0, g_0, beta_0, ..., xT_{L-1}, ..., o_slab]
    xT_l: (Cin_l, B*HW_l)   transposed, lane-dense flattened feature map
    wT_l: (HIDDEN, Cin_l)   conv weight (PyTorch (out, in) of the 1x1 conv)
    b/g/beta: (HIDDEN, 1)   per-channel conv bias / GN gamma / GN beta
    o_slab: (HIDDEN, slab_w) columns = [lvl0 b0 | lvl0 b1 | lvl1 b0 | ... | 0-pad]
  """
  in_refs = refs[:5 * n_levels]
  o_ref = refs[5 * n_levels]
  pieces = []
  cols = 0
  for l in range(n_levels):
    xT_ref, wT_ref, b_ref, g_ref, be_ref = in_refs[5 * l:5 * l + 5]
    hw = xT_ref.shape[1] // batch
    # one matmul per level: y^T = W @ x^T  -> (HIDDEN, B*HW_l)
    # (conv bias cancels under per-channel GN, kept for fidelity; it is cheap)
    yT = jnp.dot(wT_ref[...], xT_ref[...],
                 preferred_element_type=jnp.float32) + b_ref[...]
    g = g_ref[...]
    be = be_ref[...]
    for bi in range(batch):  # per-sample GN stats (vector-only, no matmuls)
      seg = yT[:, bi * hw:(bi + 1) * hw]                    # (HIDDEN, HW_l)
      mean = jnp.mean(seg, axis=1, keepdims=True)           # (HIDDEN, 1)
      c = seg - mean
      var = jnp.mean(c * c, axis=1, keepdims=True)          # biased, as PyTorch
      pieces.append(c * jax.lax.rsqrt(var + eps) * g + be)
    cols += xT_ref.shape[1]
  slab_w = o_ref.shape[1]
  if cols < slab_w:
    pieces.append(jnp.zeros((o_ref.shape[0], slab_w - cols), jnp.float32))
  # single lane-dense store of the whole slab (unmasked vst, one writeback DMA)
  o_ref[...] = jnp.concatenate(pieces, axis=1)


def input_proj_gn_fused(feats, params):
  """feats: list of (B, HW_l, Cin_l) -> list of (B, HW_l, HIDDEN)."""
  n = len(feats)
  args = []
  total_cols = 0
  for l, x in enumerate(feats):
    B, HW, Cin = x.shape
    xT = x.reshape(B * HW, Cin).T                        # (Cin, B*HW)
    args += [xT, params["proj_wT"][l], params["proj_b"][l],
             params["proj_g"][l], params["proj_beta"][l]]
    total_cols += B * HW
  slab_w = ((total_cols + 127) // 128) * 128             # pad to lane-dense width

  kernel = functools.partial(_input_proj_gn_kernel, n_levels=n, batch=BATCH,
                             eps=GN_EPS)
  # Grid-less call: every operand is tiny and lives wholly in VMEM.
  slab = pl.pallas_call(
      kernel,
      out_shape=jax.ShapeDtypeStruct((HIDDEN, slab_w), jnp.float32),
  )(*args)

  # wrapper-side layout plumbing back to (B, HW, HIDDEN) per level
  srcs = []
  off = 0
  for l, x in enumerate(feats):
    B, HW, _ = x.shape
    cols = B * HW
    srcs.append(slab[:, off:off + cols].T.reshape(B, HW, HIDDEN))
    off += cols
  return srcs


# --------------------- Pallas kernel: prediction heads -----------------------
def _pred_head_kernel(hsr_ref, wcv_ref, w1_ref, b1_ref, w2_ref, b2_ref,
                      w3_ref, bias_ref, o_ref, *, hidden, box_lo, box_hi):
  """Single grid-less step over the flattened (L*B*Q, H+4) rows.

  hsr columns: [0:H) decoder hidden state, [H:H+4) reference box (sigmoid space).
  Output slab (M, 128): cols [0:NC) class logits, [NC:NC+NV) verb logits,
  [box_lo:box_hi) = sigmoid of the 3 bbox-MLP heads (obj, sub, hoi; 4 each),
  remaining columns are zero padding (lane-dense unmasked stores).
  """
  hsr = hsr_ref[...]                                             # (M, H+4)
  m = hsr.shape[0]
  hs = hsr[:, :hidden]                                           # (M, H)
  r = jnp.clip(hsr[:, hidden:hidden + 4], 0.0, 1.0)              # (M, 4)
  ref_is = jnp.log(jnp.maximum(r, INV_SIG_EPS) /
                   jnp.maximum(1.0 - r, INV_SIG_EPS))            # inverse_sigmoid

  # class + verb logits land in columns [0:NC+NV); bias_ref already contains
  # the pre-summed class/verb bias and the box heads' last-layer bias.
  z = jnp.dot(hs, wcv_ref[...], preferred_element_type=jnp.float32) + bias_ref[...]

  # 3 bbox MLPs fused: layer1 = hstack, layer2 = block-diag, layer3 padded into
  # slab columns [box_lo:box_hi).
  h1 = jnp.maximum(
      jnp.dot(hs, w1_ref[...], preferred_element_type=jnp.float32) + b1_ref[...],
      0.0)                                                        # (M, 3H)
  h2 = jnp.maximum(
      jnp.dot(h1, w2_ref[...], preferred_element_type=jnp.float32) + b2_ref[...],
      0.0)                                                        # (M, 3H)
  z = z + jnp.dot(h2, w3_ref[...], preferred_element_type=jnp.float32)

  # add inverse_sigmoid(reference) to each head's 4 box columns (VPU add; the
  # former K=4 matmul was dropped — it left the MXU column almost empty).
  ref12 = jnp.concatenate([ref_is, ref_is, ref_is], axis=1)       # (M, 12)
  ref_pad = jnp.concatenate(
      [jnp.zeros((m, box_lo), jnp.float32), ref12,
       jnp.zeros((m, o_ref.shape[1] - box_hi), jnp.float32)], axis=1)
  z = z + ref_pad

  col = jax.lax.broadcasted_iota(jnp.int32, z.shape, 1)
  is_box = jnp.logical_and(col >= box_lo, col < box_hi)
  o_ref[...] = jnp.where(is_box, jax.nn.sigmoid(z), z)


def fuse_head_params(p, out_w=OUT_W):
  """Build fused / padded head weights ONCE (hoisted into init, not per-forward)."""
  H = p["w1"].shape[1]
  NC = p["wc"].shape[1]
  NV = p["wv"].shape[1]
  box_lo = NC + NV

  wcv = jnp.zeros((H, out_w), jnp.float32)
  wcv = wcv.at[:, :NC].set(p["wc"]).at[:, NC:NC + NV].set(p["wv"])
  # one bias for the whole slab: class + verb + box-last-layer (disjoint cols)
  bias = jnp.zeros((1, out_w), jnp.float32)
  bias = bias.at[:, :NC].set(p["bc"]).at[:, NC:NC + NV].set(p["bv"])

  w1 = jnp.concatenate([p["w1"][i] for i in range(3)], axis=1)    # (H, 3H)
  b1 = jnp.concatenate([p["b1"][i] for i in range(3)], axis=1)    # (1, 3H)
  b2 = jnp.concatenate([p["b2"][i] for i in range(3)], axis=1)    # (1, 3H)

  w2 = jnp.zeros((3 * H, 3 * H), jnp.float32)
  w3 = jnp.zeros((3 * H, out_w), jnp.float32)
  for i in range(3):
    cols = slice(box_lo + 4 * i, box_lo + 4 * (i + 1))
    w2 = w2.at[i * H:(i + 1) * H, i * H:(i + 1) * H].set(p["w2"][i])
    w3 = w3.at[i * H:(i + 1) * H, cols].set(p["w3"][i])
    bias = bias.at[:, cols].set(p["b3"][i])
  return dict(wcv=wcv, bias=bias, w1=w1, b1=b1, w2=w2, b2=b2, w3=w3)


def pred_heads(hs_stack, ref_stack, fused):
  """hs_stack: (L, B, Q, H), ref_stack: (L, B, Q, 4)."""
  L, B, Q, H = hs_stack.shape
  M = L * B * Q
  # combine hs and reference into one input slab -> one fewer narrow input DMA
  hsr = jnp.concatenate([hs_stack.reshape(M, H), ref_stack.reshape(M, 4)], axis=1)

  kernel = functools.partial(_pred_head_kernel, hidden=H,
                             box_lo=BOX_LO, box_hi=BOX_HI)
  slab = pl.pallas_call(
      kernel,
      out_shape=jax.ShapeDtypeStruct((M, OUT_W), jnp.float32),
  )(hsr, fused["wcv"], fused["w1"], fused["b1"],
    fused["w2"], fused["b2"], fused["w3"], fused["bias"])

  slab = slab.reshape(L, B, Q, OUT_W)
  cls = slab[..., :NUM_CLASSES]
  verb = slab[..., NUM_CLASSES:NUM_CLASSES + NUM_VERB_CLASSES]
  boxes = slab[..., BOX_LO:BOX_HI].reshape(L, B, Q, 3, 4)
  return cls, verb, boxes


# ------------------------- deterministic parameters --------------------------
def init_params(key):
  ks = list(jax.random.split(key, 16))
  p = {}
  # input_proj per feature level: Conv2d(Cin, HIDDEN, 1) + GroupNorm(32, HIDDEN)
  p["proj_wT"], p["proj_b"], p["proj_g"], p["proj_beta"] = [], [], [], []
  for l, cin in enumerate(BACKBONE_CHANNELS):
    bound = (6.0 / (cin + HIDDEN)) ** 0.5          # xavier_uniform_, gain=1
    p["proj_wT"].append(jax.random.uniform(ks[l], (HIDDEN, cin), jnp.float32,
                                           -bound, bound))        # (out, in)
    p["proj_b"].append(jnp.zeros((HIDDEN, 1), jnp.float32))        # constant_(bias,0)
    p["proj_g"].append(jnp.ones((HIDDEN, 1), jnp.float32))
    p["proj_beta"].append(jnp.zeros((HIDDEN, 1), jnp.float32))

  bias_value = -math.log((1.0 - 0.01) / 0.01)
  raw = dict(
      # class / verb heads (weights stored as (in, out) = PyTorch weight.T)
      wc=0.02 * jax.random.normal(ks[2], (HIDDEN, NUM_CLASSES), jnp.float32),
      bc=jnp.full((1, NUM_CLASSES), bias_value, jnp.float32),
      wv=0.02 * jax.random.normal(ks[3], (HIDDEN, NUM_VERB_CLASSES), jnp.float32),
      bv=jnp.full((1, NUM_VERB_CLASSES), bias_value, jnp.float32),
      # bbox / sub_bbox / hoi_bbox MLP(hidden, hidden, 4, 3), stacked on axis 0
      w1=0.02 * jax.random.normal(ks[4], (3, HIDDEN, HIDDEN), jnp.float32),
      b1=0.02 * jax.random.normal(ks[5], (3, 1, HIDDEN), jnp.float32),
      w2=0.02 * jax.random.normal(ks[6], (3, HIDDEN, HIDDEN), jnp.float32),
      b2=0.02 * jax.random.normal(ks[7], (3, 1, HIDDEN), jnp.float32),
      # last layer: constant_(weight, 0); bias = [0, 0, -2, -2] (per __init__)
      w3=jnp.zeros((3, HIDDEN, 4), jnp.float32),
      b3=jnp.tile(jnp.array([[0.0, 0.0, -2.0, -2.0]], jnp.float32),
                  (3, 1)).reshape(3, 1, 4),
  )
  # fused head weights built ONCE here (hoisted out of the forward path)
  p["head"] = fuse_head_params(raw)

  # DAB query embeddings (use_dab=True, num_patterns=0)
  p["tgt_embed"] = jax.random.normal(ks[8], (NUM_QUERIES, HIDDEN), jnp.float32)
  p["refpoint_embed"] = jax.random.normal(ks[9], (NUM_QUERIES, 4), jnp.float32)

  # backbone stub projection matrices (external module)
  p["backbone_proj"] = [
      0.2 * jax.random.normal(ks[10 + l], (IMG_C, c), jnp.float32)
      for l, c in enumerate(BACKBONE_CHANNELS)
  ]
  return p


# ------------------------------ forward glue ---------------------------------
def backbone_stub(img, params):
  """TODO(synk): stand-in for the external backbone; deterministic."""
  feats = []
  B, C, H, W = img.shape
  for l, stride in enumerate(BACKBONE_STRIDES):
    h, w = H // stride, W // stride
    x = img.reshape(B, C, h, stride, w, stride).mean(axis=(3, 5))  # avg pool
    x = jnp.transpose(x, (0, 2, 3, 1)).reshape(B, h * w, C)        # NCHW->flat NHWC
    feat = jnp.tanh(x @ params["backbone_proj"][l])                # (B, HW, Cl)
    mask = jnp.zeros((B, h, w), dtype=bool)
    feats.append((feat, mask, (h, w)))
  return feats


def transformer_stub(srcs_flat, query_embeds, num_layers):
  """TODO(synk): stand-in for the deformable transformer; deterministic."""
  tgt = query_embeds[:, :HIDDEN]                                    # (Q, H)
  refanchor = query_embeds[:, HIDDEN:]                              # (Q, 4)
  memory = jnp.concatenate(srcs_flat, axis=1)                       # (B, S, H)
  mem_mean = jnp.mean(memory, axis=1)                               # (B, H)
  B = memory.shape[0]
  hs = jnp.stack([
      tgt[None, :, :] + 0.1 * (lvl + 1) * jnp.tanh(mem_mean)[:, None, :]
      for lvl in range(num_layers)
  ], axis=0)                                                        # (L, B, Q, H)
  init_reference = jax.nn.sigmoid(refanchor)[None].repeat(B, axis=0)  # (B, Q, 4)
  inter_references = jnp.stack([
      jax.nn.sigmoid(refanchor + 0.05 * (lvl + 1))[None].repeat(B, axis=0)
      for lvl in range(num_layers)
  ], axis=0)                                                        # (L, B, Q, 4)
  return hs, init_reference, inter_references


@jax.jit
def dab_deformable_detr_forward(samples_img, samples_mask, params):
  # backbone (external, stubbed); samples_mask unused here (no padding).
  features = backbone_stub(samples_img, params)

  # args.dynamic = False -> no dynamic anchor boxes / offset branch
  # self.rays is None -> plain path
  feats = [f for (f, _, _) in features]
  srcs = input_proj_gn_fused(feats, params)        # one fused pallas_call

  # use_dab=True, num_patterns=0: query_embeds = cat(tgt_embed, refpoint_embed)
  query_embeds = jnp.concatenate(
      [params["tgt_embed"], params["refpoint_embed"]], axis=1)

  hs, init_reference, inter_references = transformer_stub(
      srcs, query_embeds, NUM_DEC_LAYERS)

  # reference per decoder level: lvl 0 -> init_reference, else inter[lvl-1]
  ref_stack = jnp.concatenate(
      [init_reference[None], inter_references[:NUM_DEC_LAYERS - 1]], axis=0)

  cls, verb, boxes = pred_heads(hs, ref_stack, params["head"])
  coord = boxes[..., 0, :]        # obj boxes
  sub_coord = boxes[..., 1, :]    # sub boxes
  hoi_coord = boxes[..., 2, :]    # hoi boxes

  out = {
      "pred_obj_logits": cls[-1],
      "pred_obj_boxes": coord[-1],
      "pred_verb_logits": verb[-1],
      "pred_sub_boxes": sub_coord[-1],
      "pred_hoi_boxes": hoi_coord[-1],
  }
  # aux_loss = True
  out["aux_outputs"] = [
      {"pred_obj_logits": cls[i], "pred_obj_boxes": coord[i],
       "pred_verb_logits": verb[i], "pred_sub_boxes": sub_coord[i],
       "pred_hoi_boxes": hoi_coord[i]}
      for i in range(NUM_DEC_LAYERS - 1)
  ]
  return out


# ----------------------------------- main ------------------------------------
if __name__ == "__main__":
  key = jax.random.PRNGKey(0)
  k_img, k_param = jax.random.split(key)
  samples_img = jax.random.normal(k_img, (BATCH, IMG_C, IMG_H, IMG_W),
                                  jnp.float32)
  samples_mask = jnp.zeros((BATCH, IMG_H, IMG_W), dtype=bool)
  params = init_params(k_param)

  out = dab_deformable_detr_forward(samples_img, samples_mask, params)
  jax.block_until_ready(out["pred_obj_logits"])
  jax.block_until_ready(out["pred_obj_boxes"])
  jax.block_until_ready(out["pred_verb_logits"])
  jax.block_until_ready(out["pred_sub_boxes"])
  jax.block_until_ready(out["pred_hoi_boxes"])

  assert out["pred_obj_logits"].shape == (BATCH, NUM_QUERIES, NUM_CLASSES)
  assert out["pred_obj_boxes"].shape == (BATCH, NUM_QUERIES, 4)
  assert out["pred_verb_logits"].shape == (BATCH, NUM_QUERIES, NUM_VERB_CLASSES)
  assert out["pred_sub_boxes"].shape == (BATCH, NUM_QUERIES, 4)
  assert out["pred_hoi_boxes"].shape == (BATCH, NUM_QUERIES, 4)
  assert len(out["aux_outputs"]) == NUM_DEC_LAYERS - 1
  print("KERNEL_OK")
</pallas_src>

<mosaic_0001>
module attributes {stable_mosaic.version = 11 : i64} {
  func.func @_input_proj_gn_kernel(%arg0: memref<8x128xf32, #tpu.memory_space<vmem>>, %arg1: memref<32x8xf32, #tpu.memory_space<vmem>>, %arg2: memref<32x1xf32, #tpu.memory_space<vmem>>, %arg3: memref<32x1xf32, #tpu.memory_space<vmem>>, %arg4: memref<32x1xf32, #tpu.memory_space<vmem>>, %arg5: memref<16x32xf32, #tpu.memory_space<vmem>>, %arg6: memref<32x16xf32, #tpu.memory_space<vmem>>, %arg7: memref<32x1xf32, #tpu.memory_space<vmem>>, %arg8: memref<32x1xf32, #tpu.memory_space<vmem>>, %arg9: memref<32x1xf32, #tpu.memory_space<vmem>>, %arg10: memref<32x256xf32, #tpu.memory_space<vmem>>) attributes {dimension_semantics = [], scalar_prefetch = 0 : i64, scratch_operands = 0 : i64, tpu.core_type = #tpu.core_type<tc>} {
    %c0 = arith.constant 0 : index
    %c0_0 = arith.constant 0 : index
    %0 = vector.load %arg1[%c0, %c0_0] : memref<32x8xf32, #tpu.memory_space<vmem>>, vector<32x8xf32>
    %c0_1 = arith.constant 0 : index
    %c0_2 = arith.constant 0 : index
    %1 = vector.load %arg0[%c0_1, %c0_2] : memref<8x128xf32, #tpu.memory_space<vmem>>, vector<8x128xf32>
    %cst = arith.constant dense<0.000000e+00> : vector<32x128xf32>
    %2 = tpu.matmul %0, %1, %cst {dimension_numbers = #tpu.dot_dimension_numbers<[1], [0], [0], [1], [0, 0, 1, 1], [], []>} : vector<32x8xf32>, vector<8x128xf32>, vector<32x128xf32> -> vector<32x128xf32>
    %c0_3 = arith.constant 0 : index
    %c0_4 = arith.constant 0 : index
    %3 = vector.load %arg2[%c0_3, %c0_4] : memref<32x1xf32, #tpu.memory_space<vmem>>, vector<32x1xf32>
    %4 = vector.broadcast %3 : vector<32x1xf32> to vector<32x128xf32>
    %5 = arith.addf %2, %4 : vector<32x128xf32>
    %c0_5 = arith.constant 0 : index
    %c0_6 = arith.constant 0 : index
    %6 = vector.load %arg3[%c0_5, %c0_6] : memref<32x1xf32, #tpu.memory_space<vmem>>, vector<32x1xf32>
    %c0_7 = arith.constant 0 : index
    %c0_8 = arith.constant 0 : index
    %7 = vector.load %arg4[%c0_7, %c0_8] : memref<32x1xf32, #tpu.memory_space<vmem>>, vector<32x1xf32>
    %8 = vector.extract_strided_slice %5 {offsets = [0, 0], sizes = [32, 64], strides = [1, 1]} : vector<32x128xf32> to vector<32x64xf32>
    %cst_9 = arith.constant dense<0.000000e+00> : vector<32xf32>
    %9 = vector.multi_reduction <add>, %8, %cst_9 [1] : vector<32x64xf32> to vector<32xf32>
    %10 = vector.shape_cast %9 : vector<32xf32> to vector<32x1xf32>
    %cst_10 = arith.constant 6.400000e+01 : f32
    %11 = vector.broadcast %cst_10 : f32 to vector<32x1xf32>
    %12 = arith.divf %10, %11 : vector<32x1xf32>
    %13 = vector.broadcast %12 : vector<32x1xf32> to vector<32x64xf32>
    %14 = arith.subf %8, %13 : vector<32x64xf32>
    %15 = arith.mulf %14, %14 : vector<32x64xf32>
    %cst_11 = arith.constant dense<0.000000e+00> : vector<32xf32>
    %16 = vector.multi_reduction <add>, %15, %cst_11 [1] : vector<32x64xf32> to vector<32xf32>
    %17 = vector.shape_cast %16 : vector<32xf32> to vector<32x1xf32>
    %cst_12 = arith.constant 6.400000e+01 : f32
    %18 = vector.broadcast %cst_12 : f32 to vector<32x1xf32>
    %19 = arith.divf %17, %18 : vector<32x1xf32>
    %cst_13 = arith.constant 9.99999974E-6 : f32
    %20 = vector.broadcast %cst_13 : f32 to vector<32x1xf32>
    %21 = arith.addf %19, %20 : vector<32x1xf32>
    %22 = math.rsqrt %21 : vector<32x1xf32>
    %23 = vector.broadcast %22 : vector<32x1xf32> to vector<32x64xf32>
    %24 = arith.mulf %14, %23 : vector<32x64xf32>
    %25 = vector.broadcast %6 : vector<32x1xf32> to vector<32x64xf32>
    %26 = arith.mulf %24, %25 : vector<32x64xf32>
    %27 = vector.broadcast %7 : vector<32x1xf32> to vector<32x64xf32>
    %28 = arith.addf %26, %27 : vector<32x64xf32>
    %29 = vector.extract_strided_slice %5 {offsets = [0, 64], sizes = [32, 64], strides = [1, 1]} : vector<32x128xf32> to vector<32x64xf32>
    %cst_14 = arith.constant dense<0.000000e+00> : vector<32xf32>
    %30 = vector.multi_reduction <add>, %29, %cst_14 [1] : vector<32x64xf32> to vector<32xf32>
    %31 = vector.shape_cast %30 : vector<32xf32> to vector<32x1xf32>
    %cst_15 = arith.constant 6.400000e+01 : f32
    %32 = vector.broadcast %cst_15 : f32 to vector<32x1xf32>
    %33 = arith.divf %31, %32 : vector<32x1xf32>
    %34 = vector.broadcast %33 : vector<32x1xf32> to vector<32x64xf32>
    %35 = arith.subf %29, %34 : vector<32x64xf32>
    %36 = arith.mulf %35, %35 : vector<32x64xf32>
    %cst_16 = arith.constant dense<0.000000e+00> : vector<32xf32>
    %37 = vector.multi_reduction <add>, %36, %cst_16 [1] : vector<32x64xf32> to vector<32xf32>
    %38 = vector.shape_cast %37 : vector<32xf32> to vector<32x1xf32>
    %cst_17 = arith.constant 6.400000e+01 : f32
    %39 = vector.broadcast %cst_17 : f32 to vector<32x1xf32>
    %40 = arith.divf %38, %39 : vector<32x1xf32>
    %cst_18 = arith.constant 9.99999974E-6 : f32
    %41 = vector.broadcast %cst_18 : f32 to vector<32x1xf32>
    %42 = arith.addf %40, %41 : vector<32x1xf32>
    %43 = math.rsqrt %42 : vector<32x1xf32>
    %44 = vector.broadcast %43 : vector<32x1xf32> to vector<32x64xf32>
    %45 = arith.mulf %35, %44 : vector<32x64xf32>
    %46 = vector.broadcast %6 : vector<32x1xf32> to vector<32x64xf32>
    %47 = arith.mulf %45, %46 : vector<32x64xf32>
    %48 = vector.broadcast %7 : vector<32x1xf32> to vector<32x64xf32>
    %49 = arith.addf %47, %48 : vector<32x64xf32>
    %c0_19 = arith.constant 0 : index
    %c0_20 = arith.constant 0 : index
    %50 = vector.load %arg6[%c0_19, %c0_20] : memref<32x16xf32, #tpu.memory_space<vmem>>, vector<32x16xf32>
    %c0_21 = arith.constant 0 : index
    %c0_22 = arith.constant 0 : index
    %51 = vector.load %arg5[%c0_21, %c0_22] : memref<16x32xf32, #tpu.memory_space<vmem>>, vector<16x32xf32>
    %cst_23 = arith.constant dense<0.000000e+00> : vector<32x32xf32>
    %52 = tpu.matmul %50, %51, %cst_23 {dimension_numbers = #tpu.dot_dimension_numbers<[1], [0], [0], [1], [0, 0, 1, 1], [], []>} : vector<32x16xf32>, vector<16x32xf32>, vector<32x32xf32> -> vector<32x32xf32>
    %c0_24 = arith.constant 0 : index
    %c0_25 = arith.constant 0 : index
    %53 = vector.load %arg7[%c0_24, %c0_25] : memref<32x1xf32, #tpu.memory_space<vmem>>, vector<32x1xf32>
    %54 = vector.broadcast %53 : vector<32x1xf32> to vector<32x32xf32>
    %55 = arith.addf %52, %54 : vector<32x32xf32>
    %c0_26 = arith.constant 0 : index
    %c0_27 = arith.constant 0 : index
    %56 = vector.load %arg8[%c0_26, %c0_27] : memref<32x1xf32, #tpu.memory_space<vmem>>, vector<32x1xf32>
    %c0_28 = arith.constant 0 : index
    %c0_29 = arith.constant 0 : index
    %57 = vector.load %arg9[%c0_28, %c0_29] : memref<32x1xf32, #tpu.memory_space<vmem>>, vector<32x1xf32>
    %58 = vector.extract_strided_slice %55 {offsets = [0, 0], sizes = [32, 16], strides = [1, 1]} : vector<32x32xf32> to vector<32x16xf32>
    %cst_30 = arith.constant dense<0.000000e+00> : vector<32xf32>
    %59 = vector.multi_reduction <add>, %58, %cst_30 [1] : vector<32x16xf32> to vector<32xf32>
    %60 = vector.shape_cast %59 : vector<32xf32> to vector<32x1xf32>
    %cst_31 = arith.constant 1.600000e+01 : f32
    %61 = vector.broadcast %cst_31 : f32 to vector<32x1xf32>
    %62 = arith.divf %60, %61 : vector<32x1xf32>
    %63 = vector.broadcast %62 : vector<32x1xf32> to vector<32x16xf32>
    %64 = arith.subf %58, %63 : vector<32x16xf32>
    %65 = arith.mulf %64, %64 : vector<32x16xf32>
    %cst_32 = arith.constant dense<0.000000e+00> : vector<32xf32>
    %66 = vector.multi_reduction <add>, %65, %cst_32 [1] : vector<32x16xf32> to vector<32xf32>
    %67 = vector.shape_cast %66 : vector<32xf32> to vector<32x1xf32>
    %cst_33 = arith.constant 1.600000e+01 : f32
    %68 = vector.broadcast %cst_33 : f32 to vector<32x1xf32>
    %69 = arith.divf %67, %68 : vector<32x1xf32>
    %cst_34 = arith.constant 9.99999974E-6 : f32
    %70 = vector.broadcast %cst_34 : f32 to vector<32x1xf32>
    %71 = arith.addf %69, %70 : vector<32x1xf32>
    %72 = math.rsqrt %71 : vector<32x1xf32>
    %73 = vector.broadcast %72 : vector<32x1xf32> to vector<32x16xf32>
    %74 = arith.mulf %64, %73 : vector<32x16xf32>
    %75 = vector.broadcast %56 : vector<32x1xf32> to vector<32x16xf32>
    %76 = arith.mulf %74, %75 : vector<32x16xf32>
    %77 = vector.broadcast %57 : vector<32x1xf32> to vector<32x16xf32>
    %78 = arith.addf %76, %77 : vector<32x16xf32>
    %79 = vector.extract_strided_slice %55 {offsets = [0, 16], sizes = [32, 16], strides = [1, 1]} : vector<32x32xf32> to vector<32x16xf32>
    %cst_35 = arith.constant dense<0.000000e+00> : vector<32xf32>
    %80 = vector.multi_reduction <add>, %79, %cst_35 [1] : vector<32x16xf32> to vector<32xf32>
    %81 = vector.shape_cast %80 : vector<32xf32> to vector<32x1xf32>
    %cst_36 = arith.constant 1.600000e+01 : f32
    %82 = vector.broadcast %cst_36 : f32 to vector<32x1xf32>
    %83 = arith.divf %81, %82 : vector<32x1xf32>
    %84 = vector.broadcast %83 : vector<32x1xf32> to vector<32x16xf32>
    %85 = arith.subf %79, %84 : vector<32x16xf32>
    %86 = arith.mulf %85, %85 : vector<32x16xf32>
    %cst_37 = arith.constant dense<0.000000e+00> : vector<32xf32>
    %87 = vector.multi_reduction <add>, %86, %cst_37 [1] : vector<32x16xf32> to vector<32xf32>
    %88 = vector.shape_cast %87 : vector<32xf32> to vector<32x1xf32>
    %cst_38 = arith.constant 1.600000e+01 : f32
    %89 = vector.broadcast %cst_38 : f32 to vector<32x1xf32>
    %90 = arith.divf %88, %89 : vector<32x1xf32>
    %cst_39 = arith.constant 9.99999974E-6 : f32
    %91 = vector.broadcast %cst_39 : f32 to vector<32x1xf32>
    %92 = arith.addf %90, %91 : vector<32x1xf32>
    %93 = math.rsqrt %92 : vector<32x1xf32>
    %94 = vector.broadcast %93 : vector<32x1xf32> to vector<32x16xf32>
    %95 = arith.mulf %85, %94 : vector<32x16xf32>
    %96 = vector.broadcast %56 : vector<32x1xf32> to vector<32x16xf32>
    %97 = arith.mulf %95, %96 : vector<32x16xf32>
    %98 = vector.broadcast %57 : vector<32x1xf32> to vector<32x16xf32>
    %99 = arith.addf %97, %98 : vector<32x16xf32>
    %cst_40 = arith.constant 0.000000e+00 : f32
    %100 = vector.broadcast %cst_40 : f32 to vector<32x96xf32>
    %101 = tpu.concatenate %28, %49, %78, %99, %100 in 1 : vector<32x64xf32>, vector<32x64xf32>, vector<32x16xf32>, vector<32x16xf32>, vector<32x96xf32> -> vector<32x256xf32>
    %c0_41 = arith.constant 0 : index
    %c0_42 = arith.constant 0 : index
    %102 = vector.load %arg10[%c0_41, %c0_42] : memref<32x256xf32, #tpu.memory_space<vmem>>, vector<32x256xf32>
    tpu.vector_store %arg10[%c0_41, %c0_42], %101 {strides = array<i32>} : memref<32x256xf32, #tpu.memory_space<vmem>>, vector<32x256xf32>,
    return
  }
}

module attributes {stable_mosaic.version = 11 : i64} {
  func.func @_pred_head_kernel(%arg0: memref<72x36xf32, #tpu.memory_space<vmem>>, %arg1: memref<32x128xf32, #tpu.memory_space<vmem>>, %arg2: memref<32x96xf32, #tpu.memory_space<vmem>>, %arg3: memref<1x96xf32, #tpu.memory_space<vmem>>, %arg4: memref<96x96xf32, #tpu.memory_space<vmem>>, %arg5: memref<1x96xf32, #tpu.memory_space<vmem>>, %arg6: memref<96x128xf32, #tpu.memory_space<vmem>>, %arg7: memref<1x128xf32, #tpu.memory_space<vmem>>, %arg8: memref<72x128xf32, #tpu.memory_space<vmem>>) attributes {dimension_semantics = [], scalar_prefetch = 0 : i64, scratch_operands = 0 : i64, tpu.core_type = #tpu.core_type<tc>} {
    %c0 = arith.constant 0 : index
    %c0_0 = arith.constant 0 : index
    %0 = vector.load %arg0[%c0, %c0_0] : memref<72x36xf32, #tpu.memory_space<vmem>>, vector<72x36xf32>
    %1 = vector.extract_strided_slice %0 {offsets = [0, 0], sizes = [72, 32], strides = [1, 1]} : vector<72x36xf32> to vector<72x32xf32>
    %2 = vector.extract_strided_slice %0 {offsets = [0, 32], sizes = [72, 4], strides = [1, 1]} : vector<72x36xf32> to vector<72x4xf32>
    %cst = arith.constant 0.000000e+00 : f32
    %cst_1 = arith.constant 1.000000e+00 : f32
    %3 = vector.broadcast %cst : f32 to vector<72x4xf32>
    %4 = arith.maximumf %3, %2 : vector<72x4xf32>
    %5 = vector.broadcast %cst_1 : f32 to vector<72x4xf32>
    %6 = arith.minimumf %5, %4 : vector<72x4xf32>
    %cst_2 = arith.constant 9.99999974E-6 : f32
    %7 = vector.broadcast %cst_2 : f32 to vector<72x4xf32>
    %8 = arith.maximumf %6, %7 : vector<72x4xf32>
    %cst_3 = arith.constant 1.000000e+00 : f32
    %9 = vector.broadcast %cst_3 : f32 to vector<72x4xf32>
    %10 = arith.subf %9, %6 : vector<72x4xf32>
    %cst_4 = arith.constant 9.99999974E-6 : f32
    %11 = vector.broadcast %cst_4 : f32 to vector<72x4xf32>
    %12 = arith.maximumf %10, %11 : vector<72x4xf32>
    %13 = arith.divf %8, %12 : vector<72x4xf32>
    %14 = math.log %13 : vector<72x4xf32>
    %c0_5 = arith.constant 0 : index
    %c0_6 = arith.constant 0 : index
    %15 = vector.load %arg1[%c0_5, %c0_6] : memref<32x128xf32, #tpu.memory_space<vmem>>, vector<32x128xf32>
    %cst_7 = arith.constant dense<0.000000e+00> : vector<72x128xf32>
    %16 = tpu.matmul %1, %15, %cst_7 {dimension_numbers = #tpu.dot_dimension_numbers<[1], [0], [0], [1], [0, 0, 1, 1], [], []>} : vector<72x32xf32>, vector<32x128xf32>, vector<72x128xf32> -> vector<72x128xf32>
    %c0_8 = arith.constant 0 : index
    %c0_9 = arith.constant 0 : index
    %17 = vector.load %arg7[%c0_8, %c0_9] : memref<1x128xf32, #tpu.memory_space<vmem>>, vector<1x128xf32>
    %18 = vector.broadcast %17 : vector<1x128xf32> to vector<72x128xf32>
    %19 = arith.addf %16, %18 : vector<72x128xf32>
    %c0_10 = arith.constant 0 : index
    %c0_11 = arith.constant 0 : index
    %20 = vector.load %arg2[%c0_10, %c0_11] : memref<32x96xf32, #tpu.memory_space<vmem>>, vector<32x96xf32>
    %cst_12 = arith.constant dense<0.000000e+00> : vector<72x96xf32>
    %21 = tpu.matmul %1, %20, %cst_12 {dimension_numbers = #tpu.dot_dimension_numbers<[1], [0], [0], [1], [0, 0, 1, 1], [], []>} : vector<72x32xf32>, vector<32x96xf32>, vector<72x96xf32> -> vector<72x96xf32>
    %c0_13 = arith.constant 0 : index
    %c0_14 = arith.constant 0 : index
    %22 = vector.load %arg3[%c0_13, %c0_14] : memref<1x96xf32, #tpu.memory_space<vmem>>, vector<1x96xf32>
    %23 = vector.broadcast %22 : vector<1x96xf32> to vector<72x96xf32>
    %24 = arith.addf %21, %23 : vector<72x96xf32>
    %cst_15 = arith.constant 0.000000e+00 : f32
    %25 = vector.broadcast %cst_15 : f32 to vector<72x96xf32>
    %26 = arith.maximumf %24, %25 : vector<72x96xf32>
    %c0_16 = arith.constant 0 : index
    %c0_17 = arith.constant 0 : index
    %27 = vector.load %arg4[%c0_16, %c0_17] : memref<96x96xf32, #tpu.memory_space<vmem>>, vector<96x96xf32>
    %cst_18 = arith.constant dense<0.000000e+00> : vector<72x96xf32>
    %28 = tpu.matmul %26, %27, %cst_18 {dimension_numbers = #tpu.dot_dimension_numbers<[1], [0], [0], [1], [0, 0, 1, 1], [], []>} : vector<72x96xf32>, vector<96x96xf32>, vector<72x96xf32> -> vector<72x96xf32>
    %c0_19 = arith.constant 0 : index
    %c0_20 = arith.constant 0 : index
    %29 = vector.load %arg5[%c0_19, %c0_20] : memref<1x96xf32, #tpu.memory_space<vmem>>, vector<1x96xf32>
    %30 = vector.broadcast %29 : vector<1x96xf32> to vector<72x96xf32>
    %31 = arith.addf %28, %30 : vector<72x96xf32>
    %cst_21 = arith.constant 0.000000e+00 : f32
    %32 = vector.broadcast %cst_21 : f32 to vector<72x96xf32>
    %33 = arith.maximumf %31, %32 : vector<72x96xf32>
    %c0_22 = arith.constant 0 : index
    %c0_23 = arith.constant 0 : index
    %34 = vector.load %arg6[%c0_22, %c0_23] : memref<96x128xf32, #tpu.memory_space<vmem>>, vector<96x128xf32>
    %cst_24 = arith.constant dense<0.000000e+00> : vector<72x128xf32>
    %35 = tpu.matmul %33, %34, %cst_24 {dimension_numbers = #tpu.dot_dimension_numbers<[1], [0], [0], [1], [0, 0, 1, 1], [], []>} : vector<72x96xf32>, vector<96x128xf32>, vector<72x128xf32> -> vector<72x128xf32>
    %36 = arith.addf %19, %35 : vector<72x128xf32>
    %37 = tpu.concatenate %14, %14, %14 in 1 : vector<72x4xf32>, vector<72x4xf32>, vector<72x4xf32> -> vector<72x12xf32>
    %cst_25 = arith.constant 0.000000e+00 : f32
    %38 = vector.broadcast %cst_25 : f32 to vector<72x12xf32>
    %cst_26 = arith.constant 0.000000e+00 : f32
    %39 = vector.broadcast %cst_26 : f32 to vector<72x104xf32>
    %40 = tpu.concatenate %38, %37, %39 in 1 : vector<72x12xf32>, vector<72x12xf32>, vector<72x104xf32> -> vector<72x128xf32>
    %41 = arith.addf %36, %40 : vector<72x128xf32>
    %42 = tpu.iota {dimensions = array<i32: 1>} : vector<72x128xi32>
    %c12_i32 = arith.constant 12 : i32
    %43 = vector.broadcast %c12_i32 : i32 to vector<72x128xi32>
    %44 = arith.cmpi sge, %42, %43 : vector<72x128xi32>
    %c24_i32 = arith.constant 24 : i32
    %45 = vector.broadcast %c24_i32 : i32 to vector<72x128xi32>
    %46 = arith.cmpi slt, %42, %45 : vector<72x128xi32>
    %47 = arith.andi %44, %46 : vector<72x128xi1>
    %48 = arith.negf %41 : vector<72x128xf32>
    %49 = math.exp %48 : vector<72x128xf32>
    %cst_27 = arith.constant 1.000000e+00 : f32
    %50 = vector.broadcast %cst_27 : f32 to vector<72x128xf32>
    %51 = arith.addf %50, %49 : vector<72x128xf32>
    %52 = arith.divf %50, %51 : vector<72x128xf32>
    %53 = arith.select %47, %52, %41 : vector<72x128xi1>, vector<72x128xf32>
    %c0_28 = arith.constant 0 : index
    %c0_29 = arith.constant 0 : index
    %54 = vector.load %arg8[%c0_28, %c0_29] : memref<72x128xf32, #tpu.memory_space<vmem>>, vector<72x128xf32>
    tpu.vector_store %arg8[%c0_28, %c0_29], %53 {strides = array<i32>} : memref<72x128xf32, #tpu.memory_space<vmem>>, vector<72x128xf32>,
    return
  }
}

</mosaic_0001>

<bundles_post_ra>
// kernel: dab_deformable_detr_forward.3
= control target key start
LH: loop header
LB: loop body
LE: loop exit
PB: predicated region body
PF: predicated region fallthrough
CT: control target
= control target key end

     0   :  { %vm244_vm0 = vcmask 261120   ;;  %s1087_s9 = smov 96   ;;  %s1090_s16 = smov 12   ;;  %s1715_s2 = inlined_call_operand.vmem [shape: f32[32,96], index: 2, kind: input, shape index: {}]   ;;  %s1716_s0 = inlined_call_operand.vmem [shape: f32[72,36], index: 0, kind: input, shape index: {}]   ;;  %s1717_s3 = inlined_call_operand.vmem [shape: f32[1,96], index: 3, kind: input, shape index: {}]   ;;  %s1718_s1 = inlined_call_operand.vmem [shape: f32[32,128], index: 1, kind: input, shape index: {}]   ;;  %s1719_s4 = inlined_call_operand.vmem [shape: f32[96,96], index: 4, kind: input, shape index: {}]   ;;  %s1720_s7 = inlined_call_operand.vmem [shape: f32[1,128], index: 7, kind: input, shape index: {}]   ;;  %s1721_s5 = inlined_call_operand.vmem [shape: f32[1,96], index: 5, kind: input, shape index: {}]   ;;  %s1722_s6 = inlined_call_operand.vmem [shape: f32[96,128], index: 6, kind: input, shape index: {}]   ;;  %s1723_s8 = inlined_call_operand.vmem [shape: f32[72,128], index: 8, kind: output, shape index: {}]  }
   0x1   :  { %v319_v0 = vld [vmem:[%s1715_s2 + $0x18] sm:$0xff]  ;;  %v318_v1 = vld [vmem:[%s1715_s2 + $0x10] sm:$0xff]  ;;  %v317_v2 = vld [vmem:[%s1715_s2 + $0x8] sm:$0xff] }
   0x2   :  { %336 = vmatpush.msra.mxu1 %v319_v0  ;;  %v316_v3 = vld [vmem:[%s1715_s2] sm:$0xff]  ;;  %v30_v5 = vld [vmem:[%s1716_s0 + $0x8] sm:$0xff]  ;;  %v31_v6 = vld [vmem:[%s1716_s0 + $0x10] sm:$0xff] }
   0x3   :  { %v29_v4 = vld [vmem:[%s1716_s0] sm:$0xff]  ;;  %v239_v7 = vld [vmem:[%s1718_s1 + $0x18] sm:$0xff]  ;;  %v238_v8 = vld [vmem:[%s1718_s1 + $0x10] sm:$0xff]  ;;  %v39_v15 = vmax.f32 %v30_v5, 0.0  ;;  %v40_v16 = vmax.f32 %v31_v6, 0.0 }
   0x4   :  { %337 = vmatpush.msra.mxu1 %v318_v1  ;;  %v38_v9 = vmax.f32 %v29_v4, 0.0  ;;  %284 = vmatpush.msra.mxu0 %v239_v7  ;;  %v237_v10 = vld [vmem:[%s1718_s1 + $0x8] sm:$0xff]  ;;  %v32_v12 = vld [vmem:[%s1716_s0 + $0x18] sm:$0xff]  ;;  %v236_v13 = vld [vmem:[%s1718_s1] sm:$0xff] }
   0x5   :  { %v1180_v18 = vmin.f32 %v39_v15, 1.0  ;;  %v1185_v19 = vld [vmem:[%s1716_s0 + $0x20] sm:$0xff]  ;;  %v1187_v20 = vmin.f32 %v40_v16, 1.0  ;;  %v1194_v21 = vld [vmem:[%s1716_s0 + $0x30] sm:$0xff]  ;;  %v1205_v26 = vld [vmem:[%s1716_s0 + $0x28] sm:$0xff]  ;;  %v41_v39 = vmax.f32 %v32_v12, 0.0 }
   0x6   :  { %338 = vmatpush.msra.mxu1 %v317_v2  ;;  %285 = vmatpush.msra.mxu0 %v238_v8  ;;  %v1169_v11 = vmin.f32 %v38_v9, 1.0  ;;  %v44_v23 = vmax.f32 %v1194_v21, 0.0  ;;  %v388_v31 = vld [vmem:[%s1719_s4 + $0x58] sm:$0xff]  ;;  %v387_v33 = vld [vmem:[%s1719_s4 + $0x50] sm:$0xff]  ;;  %v386_v37 = vld [vmem:[%s1719_s4 + $0x48] sm:$0xff] }
   0x7   :  { %v66_v22 = vsub.f32 1.0, %v1180_v18  ;;  %v67_v24 = vsub.f32 1.0, %v1187_v20  ;;  %984 = vmatpush.msra.mxu2 %v388_v31  ;;  %v385_v41 = vld [vmem:[%s1719_s4 + $0x40] sm:$0xff]  ;;  %v1243_v48 = vmin.f32 %v41_v39, 1.0  ;;  %v384_v50 = vld [vmem:[%s1719_s4 + $0x38] sm:$0xff]  ;;  %v383_v52 = vld [vmem:[%s1719_s4 + $0x30] sm:$0xff] }
   0x8   :  { %339 = vmatpush.msra.mxu1 %v316_v3  ;;  %286 = vmatpush.msra.mxu0 %v237_v10  ;;  %v65_v14 = vsub.f32 1.0, %v1169_v11  ;;  %v1207_v27 = vmin.f32 %v44_v23, 1.0  ;;  %v56_v46 = vmax.f32 %v1169_v11, 1e-05  ;;  %v382_v59 = vld [vmem:[%s1719_s4 + $0x28] sm:$0xff]  ;;  %v1268_v60 = vld [vmem:[%s1716_s0 + $0x38] sm:$0xff] }
   0x9   :  { %948 = vmatmul.msk.f32.vlgmr.msra.gmra.mxu1 %vm244_vm0, %v29_v4  ;;  %v1200_v25 = vmax.f32 %v66_v22, 1e-05  ;;  %v1209_v28 = vmax.f32 %v67_v24, 1e-05  ;;  %985 = vmatpush.msra.mxu2 %v387_v33  ;;  %v381_v1 = vld [vmem:[%s1719_s4 + $0x20] sm:$0xff]  ;;  %v45_v15 = vmax.f32 %v1268_v60, 0.0 }
   0xa   :  { %287 = vmatpush.msra.mxu0 %v236_v13  ;;  %v74_v17 = vmax.f32 %v65_v14, 1e-05  ;;  %v71_v30 = vsub.f32 1.0, %v1207_v27  ;;  %v58_v11 = vmax.f32 %v1187_v20, 1e-05 }
   0xb   :  { %939 = vmatmul.msk.f32.vlgmr.msra.gmra.mxu0 %vm244_vm0, %v29_v4  ;;  %986 = vmatpush.msra.mxu2 %v386_v37  ;;  %vm103_vm5 = vweird.f32 %v1200_v25  ;;  %v109_v54 = vand.u32 2147483648, %v1200_v25  ;;  %v107_v58 = vand.u32 2147483647, %v1200_v25  ;;  %vm118_vm7 = vweird.f32 %v1209_v28 }
   0xc   :  { %1015 = vrcp.f32 %v74_v17  ;;  %425 = vmatpush.msrb.mxu0 %v388_v31  ;;  %v94_v34 = vand.u32 2147483648, %v74_v17  ;;  %vm88_vm1 = vweird.f32 %v74_v17  ;;  %v92_v36 = vand.u32 2147483647, %v74_v17  ;;  %v1333_v31 = vld [vmem:[%s1716_s0 + $0x40] sm:$0xff]  ;;  %s1088_s0 = smov 100  }
   0xd   :  { %1017 = vrcp.f32 %v1200_v25  ;;  %v1226_v38 = vmax.f32 %v71_v30, 1e-05  ;;  %987 = vmatpush.msra.mxu2 %v385_v41  ;;  %v122_v62 = vand.u32 2147483647, %v1209_v28  ;;  %v124_v0 = vand.u32 2147483648, %v1209_v28 }
   0xe   :  { %1019 = vrcp.f32 %v1209_v28  ;;  %426 = vmatpush.msrb.mxu0 %v387_v33  ;;  %v95_v44 = vor.u32 1.1754944e-38, %v94_v34  ;;  %vm93_vm4 = vcmp.eq.f32.partialorder %v92_v36, 8.507059e+37  ;;  %v110_v4 = vor.u32 1.1754944e-38, %v109_v54 }
   0xf   :  { %1021 = vrcp.f32 %v1226_v38  ;;  %988 = vmatpush.msra.mxu2 %v384_v50  ;;  %vm1291_vm10 = vcmp.eq.f32.partialorder %v107_v58, 8.507059e+37  ;;  %v125_v10 = vor.u32 1.1754944e-38, %v124_v0  ;;  %vm1306_vm12 = vcmp.eq.f32.partialorder %v122_v62, 8.507059e+37 }
  0x10   :  { %427 = vmatpush.msrb.mxu0 %v386_v37  ;;  %vm178_vm13 = vweird.f32 %v1226_v38  ;;  %v184_v23 = vand.u32 2147483648, %v1226_v38  ;;  %v182_v30 = vand.u32 2147483647, %v1226_v38  ;;  %v62_v39 = vmax.f32 %v1207_v27, 1e-05 }
  0x11   :  { %949 = vmatmul.msk.f32.gmra.mxu1 %vm244_vm0, %v30_v5  ;;  %989 = vmatpush.msra.mxu2 %v383_v52 }
  0x12   :  { %v1016_v29 = vpop.eup %1015  ;;  %428 = vmatpush.msrb.mxu0 %v385_v41  ;;  %v185_v37 = vor.u32 1.1754944e-38, %v184_v23  ;;  %v42_v41 = vmax.f32 %v1185_v19, 0.0 }
  0x13   :  { %940 = vmatmul.msk.f32.gmra.mxu0 %vm244_vm0, %v30_v5  ;;  %v84_v32 = vmul.f32 %v1016_v29, %v74_v17  ;;  %vm89_vm2 = vweird.f32 %v1016_v29  ;;  %v1231_v42 = vpop.eup %1017  ;;  %990 = vmatpush.msra.mxu2 %v382_v59  ;;  %v380_v17 = vld [vmem:[%s1719_s4 + $0x18] sm:$0xff] }
  0x14   :  { %vm1233_vm3 = vmor %vm88_vm1, %vm89_vm2  ;;  %v1237_v45 = vpop.eup %1019  ;;  %v99_v51 = vmul.f32 %v1231_v42, %v1200_v25  ;;  %429 = vmatpush.msrb.mxu0 %v384_v50  ;;  %vm104_vm6 = vweird.f32 %v1231_v42  ;;  %vm183_vm1 = vcmp.eq.f32.partialorder %v182_v30, 8.507059e+37  ;;  %v1353_v27 = vmin.f32 %v42_v41, 1.0 }
  0x15   :  { %v85_v35 = vsub.f32 1.0, %v84_v32  ;;  %v114_v55 = vmul.f32 %v1237_v45, %v1209_v28  ;;  %vm119_vm8 = vweird.f32 %v1237_v45  ;;  %v1022_v2 = vpop.eup %1021  ;;  %vm1282_vm9 = vmor %vm103_vm5, %vm104_vm6  ;;  %991 = vmatpush.msra.mxu2 %v381_v1 }
  0x16   :  { %v100_v57 = vsub.f32 1.0, %v99_v51  ;;  %430 = vmatpush.msrb.mxu0 %v383_v52  ;;  %vm1299_vm11 = vmor %vm118_vm7, %vm119_vm8  ;;  %vm179_vm14 = vweird.f32 %v1022_v2  ;;  %v69_v51 = vsub.f32 1.0, %v1353_v27  ;;  %v43_v52 = vmax.f32 %v1205_v26, 0.0 }
  0x17   :  { %v86_v40 = vmul.f32 %v1016_v29, %v85_v35  ;;  %v115_v61 = vsub.f32 1.0, %v114_v55  ;;  %992 = vmatpush.msra.mxu2 %v380_v17  ;;  %v1337_v35 = vmin.f32 %v45_v15, 1.0  ;;  %vm180_vm15 = vmor %vm178_vm13, %vm179_vm14 }
  0x18   :  { %v101_v63 = vmul.f32 %v1231_v42, %v100_v57  ;;  %431 = vmatpush.msrb.mxu0 %v382_v59  ;;  %v1367_v57 = vmax.f32 %v69_v51, 1e-05  ;;  %v1369_v58 = vmin.f32 %v43_v52, 1.0 }
  0x19   :  { %950 = vmatmul.msk.f32.gmra.mxu1 %vm244_vm0, %v31_v6  ;;  %v87_v47 = vadd.f32 %v1016_v29, %v86_v40  ;;  %v116_v5 = vmul.f32 %v1237_v45, %v115_v61 }
  0x1a   :  { %v102_v7 = vadd.f32 %v1231_v42, %v101_v63  ;;  %432 = vmatpush.msrb.mxu0 %v381_v1  ;;  %v70_v0 = vsub.f32 1.0, %v1369_v58  ;;  %v46_v1 = vmax.f32 %v1333_v31, 0.0 }
  0x1b   :  { %941 = vmatmul.msk.f32.gmra.mxu0 %vm244_vm0, %v31_v6  ;;  %v91_v49 = vsel %vm1233_vm3, %v1016_v29, %v87_v47  ;;  %v57_v6 = vmax.f32 %v1180_v18, 1e-05  ;;  %v117_v13 = vadd.f32 %v1237_v45, %v116_v5  ;;  %v174_v18 = vmul.f32 %v1022_v2, %v1226_v38 }
  0x1c   :  { %v96_v53 = vsel %vm93_vm4, %v95_v44, %v91_v49  ;;  %v106_v16 = vsel %vm1282_vm9, %v1231_v42, %v102_v7  ;;  %433 = vmatpush.msrb.mxu0 %v380_v17  ;;  %v72_v42 = vsub.f32 1.0, %v1337_v35  ;;  %v1379_v7 = vmax.f32 %v70_v0, 1e-05 }
  0x1d   :  { %v97_v56 = vmul.f32 %v96_v53, %v56_v46  ;;  %v111_v20 = vsel %vm1291_vm10, %v110_v4, %v106_v16  ;;  %v121_v22 = vsel %vm1299_vm11, %v1237_v45, %v117_v13  ;;  %v175_v29 = vsub.f32 1.0, %v174_v18  ;;  %v379_v18 = vld [vmem:[%s1719_s4 + $0x10] sm:$0xff] }
  0x1e   :  { %v112_v25 = vmul.f32 %v111_v20, %v57_v6  ;;  %v126_v28 = vsel %vm1306_vm12, %v125_v10, %v121_v22  ;;  %v81_v49 = vmax.f32 %v72_v42, 1e-05  ;;  %v1381_v8 = vmin.f32 %v46_v1, 1.0  ;;  %434 = vmatpush.msrb.mxu0 %v379_v18  ;;  %993 = vmatpush.msra.mxu2 %v379_v18 }
  0x1f   :  { %1023 = vlog2.f32 %v97_v56  ;;  %v127_v33 = vmul.f32 %v126_v28, %v58_v11  ;;  %v176_v36 = vmul.f32 %v1022_v2, %v175_v29  ;;  %v378_v28 = vld [vmem:[%s1719_s4 + $0x8] sm:$0xff]  ;;  %vm163_vm13 = vweird.f32 %v1379_v7 }
  0x20   :  { %1025 = vlog2.f32 %v112_v25  ;;  %v199_v11 = vand.u32 2147483648, %v81_v49  ;;  %vm193_vm6 = vweird.f32 %v81_v49  ;;  %v197_v13 = vand.u32 2147483647, %v81_v49  ;;  %435 = vmatpush.msrb.mxu0 %v378_v28  ;;  %994 = vmatpush.msra.mxu2 %v378_v28 }
  0x21   :  { %951 = vmatmul.msk.f32.gmra.mxu1 %vm244_vm0, %v32_v12  ;;  %1027 = vlog2.f32 %v127_v33  ;;  %v177_v40 = vadd.f32 %v1022_v2, %v176_v36  ;;  %v73_v14 = vsub.f32 1.0, %v1381_v8  ;;  %v60_v33 = vmax.f32 %v1353_v27, 1e-05 }
  0x22   :  { %v200_v15 = vor.u32 1.1754944e-38, %v199_v11  ;;  %vm198_vm9 = vcmp.eq.f32.partialorder %v197_v13, 8.507059e+37  ;;  %v167_v52 = vand.u32 2147483647, %v1379_v7 }
  0x23   :  { %942 = vmatmul.msk.f32.gmra.mxu0 %vm244_vm0, %v32_v12  ;;  %v68_v12 = vsub.f32 1.0, %v1243_v48  ;;  %v181_v43 = vsel %vm180_vm15, %v1022_v2, %v177_v40  ;;  %v1394_v25 = vmax.f32 %v73_v14, 1e-05 }
  0x24   :  { %v186_v44 = vsel %vm183_vm1, %v185_v37, %v181_v43  ;;  %v152_v37 = vand.u32 2147483647, %v1367_v57  ;;  %vm168_vm1 = vcmp.eq.f32.partialorder %v167_v52, 8.507059e+37 }
  0x25   :  { %v1024_v24 = vpop.eup %1023  ;;  %v77_v34 = vmax.f32 %v68_v12, 1e-05  ;;  %v187_v45 = vmul.f32 %v186_v44, %v62_v39  ;;  %v212_v1 = vand.u32 2147483647, %v1394_v25 }
  0x26   :  { %v1335_v32 = vmul.f32 0.6931472, %v1024_v24  ;;  %v1026_v38 = vpop.eup %1025  ;;  %vm153_vm12 = vcmp.eq.f32.partialorder %v152_v37, 8.507059e+37  ;;  %v483_v37 = vld [vmem:[%s1722_s6 + $0x48] sm:$0xff] }
  0x27   :  { %1029 = vrcp.f32 %v77_v34  ;;  %v1028_v46 = vpop.eup %1027  ;;  %v1351_v47 = vmul.f32 0.6931472, %v1026_v38  ;;  %v139_v62 = vand.u32 2147483648, %v77_v34  ;;  %vm133_vm2 = vweird.f32 %v77_v34 }
  0x28   :  { %575 = vrot.lane.b32.xlu0 %v1335_v32, %s1087_s9  ;;  %v1355_v50 = vmul.f32 0.6931472, %v1028_v46  ;;  %1031 = vlog2.f32 %v187_v45 }
  0x29   :  { %952 = vmatmul.msk.f32.gmra.mxu1 %vm244_vm0, %v1185_v19  ;;  %1033 = vrcp.f32 %v81_v49  ;;  %v140_v2 = vor.u32 1.1754944e-38, %v139_v62 }
  0x2a   :  { %579 = vrot.lane.b32.xlu1 %v1355_v50, %s1087_s9  ;;  %1035 = vrcp.f32 %v1367_v57 }
  0x2b   :  { %943 = vmatmul.msk.f32.gmra.mxu0 %vm244_vm0, %v1185_v19 }
  0x2d   :  { %v1030_v19 = vpop.eup %1029 }
  0x2e   :  { %v129_v53 = vmul.f32 %v1030_v19, %v77_v34  ;;  %v1032_v54 = vpop.eup %1031  ;;  %vm134_vm3 = vweird.f32 %v1030_v19 }
  0x2f   :  { %v1365_v55 = vmul.f32 0.6931472, %v1032_v54  ;;  %v1034_v61 = vpop.eup %1033  ;;  %vm135_vm4 = vmor %vm133_vm2, %vm134_vm3  ;;  %vm208_vm2 = vweird.f32 %v1394_v25 }
  0x30   :  { %577 = vrot.lane.b32.xlu0 %v1351_v47, %s1087_s9  ;;  %v130_v56 = vsub.f32 1.0, %v129_v53  ;;  %v189_v4 = vmul.f32 %v1034_v61, %v81_v49  ;;  %v1036_v10 = vpop.eup %1035  ;;  %vm194_vm7 = vweird.f32 %v1034_v61  ;;  %v61_v49 = vmax.f32 %v1369_v58, 1e-05 }
  0x31   :  { %953 = vmatmul.msk.f32.gmra.mxu1 %vm244_vm0, %v1205_v26  ;;  %vm195_vm8 = vmor %vm193_vm6, %vm194_vm7  ;;  %v144_v17 = vmul.f32 %v1036_v10, %v1367_v57  ;;  %vm149_vm10 = vweird.f32 %v1036_v10  ;;  %vm393_vm6 = vcmask 785408   ;;  %vm656_vm7 = vcmask 31744  }
  0x32   :  { %v131_v59 = vmul.f32 %v1030_v19, %v130_v56  ;;  %v190_v6 = vsub.f32 1.0, %v189_v4 }
  0x33   :  { %944 = vmatmul.msk.f32.gmra.mxu0 %vm244_vm0, %v1205_v26  ;;  %v59_v26 = vmax.f32 %v1243_v48, 1e-05  ;;  %v145_v24 = vsub.f32 1.0, %v144_v17 }
  0x34   :  { %v132_v63 = vadd.f32 %v1030_v19, %v131_v59  ;;  %v191_v9 = vmul.f32 %v1034_v61, %v190_v6 }
  0x35   :  { %v146_v30 = vmul.f32 %v1036_v10, %v145_v24 }
  0x36   :  { %v136_v3 = vsel %vm135_vm4, %v1030_v19, %v132_v63  ;;  %v192_v12 = vadd.f32 %v1034_v61, %v191_v9  ;;  %v169_v19 = vand.u32 2147483648, %v1379_v7  ;;  %v64_v63 = vmax.f32 %v1381_v8, 1e-05 }
  0x37   :  { %v147_v36 = vadd.f32 %v1036_v10, %v146_v30 }
  0x38   :  { %587 = vrot.lane.b32.xlu0 %v1365_v55, %s1087_s9  ;;  %v196_v16 = vsel %vm195_vm8, %v1034_v61, %v192_v12  ;;  %v170_v53 = vor.u32 1.1754944e-38, %v169_v19  ;;  %v477_v19 = vld [vmem:[%s1722_s6 + $0x18] sm:$0xff]  ;;  %vm666_vm8 = vcmask 64512  }
  0x39   :  { %954 = vmatmul.msk.f32.gmra.mxu1 %vm244_vm0, %v1194_v21  ;;  %v201_v20 = vsel %vm198_vm9, %v200_v15, %v196_v16  ;;  %vm712_vm9 = vcmask 97280  }
  0x3b   :  { %945 = vmatmul.msk.f32.gmra.mxu0 %vm244_vm0, %v1194_v21  ;;  %v137_v21 = vand.u32 2147483647, %v77_v34  ;;  %v377_v34 = vld [vmem:[%s1719_s4] sm:$0xff]  ;;  %s1089_s4 = smov 104  }
  0x3c   :  { %436 = vmatpush.msrb.mxu0 %v377_v34  ;;  %995 = vmatpush.msra.mxu2 %v377_v34 }
  0x3d   :  { %vm138_vm5 = vcmp.eq.f32.partialorder %v137_v21, 8.507059e+37  ;;  %v214_v21 = vand.u32 2147483648, %v1394_v25 }
  0x3e   :  { %v141_v48 = vsel %vm138_vm5, %v140_v2, %v136_v3  ;;  %vm213_vm5 = vcmp.eq.f32.partialorder %v212_v1, 8.507059e+37 }
  0x3f   :  { %v142_v5 = vmul.f32 %v141_v48, %v59_v26  ;;  %v215_v2 = vor.u32 1.1754944e-38, %v214_v21 }
  0x40   :  { %602 = vrot.lane.b32.xlu0 %v1335_v32, %s1088_s0 }
  0x41   :  { %955 = vmatmul.msk.f32.gmra.mxu1 %vm244_vm0, %v1268_v60  ;;  %1037 = vlog2.f32 %v142_v5 }
  0x42   :  { %1039 = vrcp.f32 %v1379_v7 }
  0x43   :  { %946 = vmatmul.msk.f32.gmra.mxu0 %vm244_vm0, %v1268_v60  ;;  %v63_v60 = vmax.f32 %v1337_v35, 1e-05  ;;  %v154_v35 = vand.u32 2147483648, %v1367_v57 }
  0x45   :  { %v202_v23 = vmul.f32 %v201_v20, %v63_v60  ;;  %v155_v39 = vor.u32 1.1754944e-38, %v154_v35 }
  0x47   :  { %v1038_v22 = vpop.eup %1037  ;;  %1041 = vlog2.f32 %v202_v23 }
  0x48   :  { %v1399_v29 = vmul.f32 0.6931472, %v1038_v22  ;;  %1043 = vrcp.f32 %v1394_v25 }
  0x49   :  { %956 = vmatmul.msk.f32.gmra.mxu1 %vm244_vm0, %v1333_v31 }
  0x4a   :  { %581 = vrot.lane.b32.xlu1 %v1399_v29, %s1087_s9  ;;  %608 = vrot.lane.b32.xlu0 %v1399_v29, %s1088_s0 }
  0x4b   :  { %947 = vmatmul.msk.f32.gmra.mxu0 %vm244_vm0, %v1333_v31  ;;  %v1040_v31 = vpop.eup %1039  ;;  %vm148_vm0 = vweird.f32 %v1367_v57 }
  0x4c   :  { %vm150_vm11 = vmor %vm148_vm0, %vm149_vm10  ;;  %v159_v41 = vmul.f32 %v1040_v31, %v1379_v7  ;;  %vm164_vm14 = vweird.f32 %v1040_v31  ;;  %vm722_vm0 = vcmask 195584  }
  0x4d   :  { %v151_v40 = vsel %vm150_vm11, %v1036_v10, %v147_v36  ;;  %v1042_v43 = vpop.eup %1041  ;;  %vm165_vm15 = vmor %vm163_vm13, %vm164_vm14  ;;  %v484_v36 = vld [vmem:[%s1722_s6 + $0x50] sm:$0xff] }
  0x4e   :  { %v156_v42 = vsel %vm153_vm12, %v155_v39, %v151_v40  ;;  %v160_v38 = vsub.f32 1.0, %v159_v41  ;;  %v1414_v45 = vmul.f32 0.6931472, %v1042_v43  ;;  %v1044_v27 = vpop.eup %1043  ;;  %v482_v40 = vld [vmem:[%s1722_s6 + $0x40] sm:$0xff]  ;;  %v481_v41 = vld [vmem:[%s1722_s6 + $0x38] sm:$0xff] }
  0x4f   :  { %v157_v44 = vmul.f32 %v156_v42, %v60_v33  ;;  %v204_v56 = vmul.f32 %v1044_v27, %v1394_v25  ;;  %vm209_vm3 = vweird.f32 %v1044_v27 }
  0x50   :  { %v161_v46 = vmul.f32 %v1040_v31, %v160_v38  ;;  %vm210_vm4 = vmor %vm208_vm2, %vm209_vm3 }
  0x51   :  { %1045 = vlog2.f32 %v157_v44  ;;  %v205_v61 = vsub.f32 1.0, %v204_v56 }
  0x52   :  { %589 = vrot.lane.b32.xlu1 %v1414_v45, %s1087_s9  ;;  %614 = vrot.lane.b32.xlu0 %v1365_v55, %s1088_s0  ;;  %v162_v51 = vadd.f32 %v1040_v31, %v161_v46  ;;  %v479_v46 = vld [vmem:[%s1722_s6 + $0x28] sm:$0xff] }
  0x53   :  { %v206_v62 = vmul.f32 %v1044_v27, %v205_v61  ;;  %v1525_v61 = vld [vmem:[%s1720_s7] ss:$0 sm:$0xff] }
  0x54   :  { %v166_v54 = vsel %vm165_vm15, %v1040_v31, %v162_v51  ;;  %v485_v31 = vld [vmem:[%s1722_s6 + $0x58] sm:$0xff] }
  0x55   :  { %v171_v57 = vsel %vm168_vm1, %v170_v53, %v166_v54  ;;  %v207_v0 = vadd.f32 %v1044_v27, %v206_v62  ;;  %517 = vmatpush.msrb.mxu1 %v485_v31  ;;  %996 = vmatpush.msra.mxu3 %v485_v31 }
  0x56   :  { %v172_v59 = vmul.f32 %v171_v57, %v61_v49 }
  0x57   :  { %v1046_v58 = vpop.eup %1045  ;;  %v211_v3 = vsel %vm210_vm4, %v1044_v27, %v207_v0  ;;  %518 = vmatpush.msrb.mxu1 %v484_v36  ;;  %997 = vmatpush.msra.mxu3 %v484_v36  ;;  %v478_v27 = vld [vmem:[%s1722_s6 + $0x20] sm:$0xff] }
  0x58   :  { %v227_v26 = vmul.f32 0.6931472, %v1046_v58  ;;  %1047 = vlog2.f32 %v172_v59  ;;  %v216_v4 = vsel %vm213_vm5, %v215_v2, %v211_v3 }
  0x59   :  { %v217_v5 = vmul.f32 %v216_v4, %v64_v63  ;;  %519 = vmatpush.msrb.mxu1 %v483_v37  ;;  %998 = vmatpush.msra.mxu3 %v483_v37 }
  0x5a   :  { %583 = vrot.lane.b32.xlu2 %v227_v26, %s1087_s9  ;;  %604 = vrot.lane.b32.xlu1 %v1351_v47, %s1088_s0 }
  0x5b   :  { %629 = vrot.lane.b32.xlu0 %v1335_v32, %s1089_s4  ;;  %1049 = vlog2.f32 %v217_v5  ;;  %v1441_v32 = vld [vmem:[%s1717_s3] ss:$0 sm:$0xff]  ;;  %520 = vmatpush.msrb.mxu1 %v482_v40  ;;  %v476_v5 = vld [vmem:[%s1722_s6 + $0x10] sm:$0xff] }
  0x5c   :  { %999 = vmatpush.msra.mxu3 %v482_v40 }
  0x5d   :  { %521 = vmatpush.msrb.mxu1 %v481_v41 }
  0x5e   :  { %v1048_v48 = vpop.eup %1047  ;;  %1000 = vmatpush.msra.mxu3 %v481_v41 }
  0x5f   :  { %v229_v6 = vmul.f32 0.6931472, %v1048_v48 }
  0x61   :  { %v1050_v7 = vpop.eup %1049 }
  0x62   :  { %585 = vrot.lane.b32.xlu2 %v229_v6, %s1087_s9  ;;  %610 = vrot.lane.b32.xlu1 %v227_v26, %s1088_s0  ;;  %v235_v10 = vmul.f32 0.6931472, %v1050_v7 }
  0x63   :  { %635 = vrot.lane.b32.xlu0 %v1399_v29, %s1089_s4 }
  0x6a   :  { %591 = vrot.lane.b32.xlu2 %v235_v10, %s1087_s9  ;;  %616 = vrot.lane.b32.xlu1 %v1414_v45, %s1088_s0 }
  0x6b   :  { %641 = vrot.lane.b32.xlu0 %v1365_v55, %s1089_s4 }
  0x72   :  { %606 = vrot.lane.b32.xlu2 %v1355_v50, %s1088_s0  ;;  %631 = vrot.lane.b32.xlu1 %v1351_v47, %s1089_s4 }
  0x7a   :  { %612 = vrot.lane.b32.xlu2 %v229_v6, %s1088_s0  ;;  %637 = vrot.lane.b32.xlu1 %v227_v26, %s1089_s4 }
  0x82   :  { %618 = vrot.lane.b32.xlu2 %v235_v10, %s1088_s0  ;;  %643 = vrot.lane.b32.xlu1 %v1414_v45, %s1089_s4  ;;  %v480_v45 = vld [vmem:[%s1722_s6 + $0x30] sm:$0xff] }
  0x83   :  { %522 = vmatpush.msrb.mxu1 %v480_v45  ;;  %1001 = vmatpush.msra.mxu3 %v480_v45 }
  0x85   :  { %523 = vmatpush.msrb.mxu1 %v479_v46  ;;  %1002 = vmatpush.msra.mxu3 %v479_v46 }
  0x86   :  { %v341_v8 = vpop.f32.mrf.mxu1 }
  0x87   :  { %v342_v9 = vadd.f32 %v1441_v32, %v341_v8  ;;  %524 = vmatpush.msrb.mxu1 %v478_v27  ;;  %1003 = vmatpush.msra.mxu3 %v478_v27  ;;  %v474_v8 = vld [vmem:[%s1722_s6] sm:$0xff] }
  0x88   :  { %v1461_v18 = vpop.f32.mrf.mxu0 }
  0x89   :  { %v368_v60 = vmax.f32 %v342_v9, 0.0  ;;  %525 = vmatpush.msrb.mxu1 %v477_v19  ;;  %1004 = vmatpush.msra.mxu3 %v477_v19 }
  0x8a   :  { %633 = vrot.lane.b32.xlu2 %v1355_v50, %s1089_s4 }
  0x8b   :  { %957 = vmatmul.msk.f32.vlgmr.msrb.gmra.mxu0 %vm393_vm6, %v368_v60  ;;  %526 = vmatpush.msrb.mxu1 %v476_v5 }
  0x8c   :  { %1005 = vmatpush.msra.mxu3 %v476_v5 }
  0x8e   :  { %v344_v11 = vpop.f32.mrf.mxu1 }
  0x8f   :  { %v345_v12 = vadd.f32 %v1441_v32, %v344_v11 }
  0x90   :  { %v1468_v23 = vpop.f32.mrf.mxu0 }
  0x91   :  { %v369_v13 = vmax.f32 %v345_v12, 0.0 }
  0x92   :  { %639 = vrot.lane.b32.xlu2 %v229_v6, %s1089_s4  ;;  %v475_v6 = vld [vmem:[%s1722_s6 + $0x8] sm:$0xff] }
  0x93   :  { %958 = vmatmul.msk.f32.vlgmr.msra.gmra.mxu2 %vm393_vm6, %v369_v13  ;;  %527 = vmatpush.msrb.mxu1 %v475_v6 }
  0x94   :  { %1006 = vmatpush.msra.mxu3 %v475_v6 }
  0x95   :  { %528 = vmatpush.msrb.mxu1 %v474_v8 }
  0x96   :  { %v347_v14 = vpop.f32.mrf.mxu1  ;;  %1007 = vmatpush.msra.mxu3 %v474_v8 }
  0x97   :  { %v348_v15 = vadd.f32 %v1441_v32, %v347_v14 }
  0x98   :  { %v1474_v29 = vpop.f32.mrf.mxu0 }
  0x99   :  { %v370_v16 = vmax.f32 %v348_v15, 0.0 }
  0x9a   :  { %645 = vrot.lane.b32.xlu2 %v235_v10, %s1089_s4  ;;  %v1491_v39 = vpop.permute.xlu0 %575 }
  0x9b   :  { %959 = vmatmul.msk.f32.gmra.mxu2 %vm393_vm6, %v370_v16 }
  0x9c   :  { %v580_v58 = vpop.permute.xlu1 %579 }
  0x9e   :  { %v350_v55 = vpop.f32.mrf.mxu1 }
  0x9f   :  { %v351_v17 = vadd.f32 %v1441_v32, %v350_v55 }
  0xa0   :  { %v1482_v34 = vpop.f32.mrf.mxu0 }
  0xa1   :  { %v371_v20 = vmax.f32 %v351_v17, 0.0 }
  0xa2   :  { %v578_v49 = vpop.permute.xlu0 %577 }
  0xa3   :  { %960 = vmatmul.msk.f32.gmra.mxu2 %vm393_vm6, %v371_v20 }
  0xa6   :  { %v353_v47 = vpop.f32.mrf.mxu1 }
  0xa7   :  { %v354_v22 = vadd.f32 %v1441_v32, %v353_v47 }
  0xa8   :  { %v1501_v44 = vpop.f32.mrf.mxu0 }
  0xa9   :  { %v372_v24 = vmax.f32 %v354_v22, 0.0 }
  0xaa   :  { %v588_v56 = vpop.permute.xlu0 %587 }
  0xab   :  { %961 = vmatmul.msk.f32.gmra.mxu2 %vm393_vm6, %v372_v24  ;;  %v1014_v24 = vld [vmem:[%s1721_s5] ss:$0 sm:$0xff] }
  0xae   :  { %v356_v25 = vpop.f32.mrf.mxu1 }
  0xaf   :  { %v357_v28 = vadd.f32 %v1441_v32, %v356_v25 }
  0xb0   :  { %v1517_v53 = vpop.f32.mrf.mxu0 }
  0xb1   :  { %v373_v30 = vmax.f32 %v357_v28, 0.0 }
  0xb2   :  { %v603_v62 = vpop.permute.xlu0 %602 }
  0xb3   :  { %962 = vmatmul.msk.f32.gmra.mxu2 %vm393_vm6, %v373_v30  ;;  %v657_v11 = vsel %vm656_vm7, %v1491_v39, %v603_v62 }
  0xb4   :  { %v584_v59 = vpop.permute.xlu2 %583 }
  0xb6   :  { %v359_v33 = vpop.f32.mrf.mxu1 }
  0xb7   :  { %v360_v50 = vadd.f32 %v1441_v32, %v359_v33 }
  0xb8   :  { %v1520_v57 = vpop.f32.mrf.mxu0 }
  0xb9   :  { %v374_v35 = vmax.f32 %v360_v50, 0.0 }
  0xbb   :  { %963 = vmatmul.msk.f32.gmra.mxu2 %vm393_vm6, %v374_v35 }
  0xbc   :  { %v1530_v21 = vpop.permute.xlu2 %585  ;;  %v582_v0 = vpop.permute.xlu1 %581 }
  0xbd   :  { %v609_v3 = vpop.permute.xlu0 %608 }
  0xbe   :  { %v362_v42 = vpop.f32.mrf.mxu1  ;;  %v660_v28 = vsel %vm656_vm7, %v582_v0, %v609_v3 }
  0xbf   :  { %v363_v43 = vadd.f32 %v1441_v32, %v362_v42 }
  0xc0   :  { %v310_v26 = vpop.f32.mrf.mxu0 }
  0xc1   :  { %v375_v38 = vmax.f32 %v363_v43, 0.0  ;;  %v1528_v63 = vadd.f32 %v1525_v61, %v310_v26 }
  0xc3   :  { %964 = vmatmul.msk.f32.gmra.mxu2 %vm393_vm6, %v375_v38 }
  0xc4   :  { %v1535_v4 = vpop.permute.xlu2 %591  ;;  %v590_v48 = vpop.permute.xlu1 %589 }
  0xc5   :  { %v615_v9 = vpop.permute.xlu0 %614 }
  0xc6   :  { %v365_v51 = vpop.f32.mrf.mxu1  ;;  %v663_v39 = vsel %vm656_vm7, %v588_v56, %v615_v9 }
  0xc7   :  { %v366_v52 = vadd.f32 %v1441_v32, %v365_v51 }
  0xc8   :  { %v313_v1 = vpop.f32.mrf.mxu0 }
  0xc9   :  { %v376_v54 = vmax.f32 %v366_v52, 0.0  ;;  %v1533_v2 = vadd.f32 %v1525_v61, %v313_v1 }
  0xcb   :  { %965 = vmatmul.msk.f32.gmra.mxu2 %vm393_vm6, %v376_v54 }
  0xcc   :  { %v607_v32 = vpop.permute.xlu2 %606  ;;  %v605_v7 = vpop.permute.xlu1 %604 }
  0xcd   :  { %v630_v12 = vpop.permute.xlu0 %629  ;;  %v659_v16 = vsel %vm656_vm7, %v580_v58, %v607_v32  ;;  %v658_v55 = vsel %vm656_vm7, %v578_v49, %v605_v7 }
  0xce   :  { %v667_v13 = vsel %vm666_vm8, %v657_v11, %v630_v12 }
  0xcf   :  { %685 = vrot.lane.b32.xlu0 %v667_v13, %s1090_s16 }
  0xd4   :  { %v613_v10 = vpop.permute.xlu2 %612  ;;  %v611_v60 = vpop.permute.xlu1 %610 }
  0xd5   :  { %v661_v31 = vsel %vm656_vm7, %v584_v59, %v611_v60  ;;  %v636_v35 = vpop.permute.xlu0 %635  ;;  %v662_v51 = vsel %vm656_vm7, %v1530_v21, %v613_v10 }
  0xd6   :  { %v670_v37 = vsel %vm666_vm8, %v660_v28, %v636_v35  ;;  %v290_v28 = vadd.f32 %v1525_v61, %v1461_v18  ;;  %v293_v18 = vadd.f32 %v1525_v61, %v1468_v23 }
  0xd7   :  { %691 = vrot.lane.b32.xlu0 %v670_v37, %s1090_s16 }
  0xdc   :  { %v619_v14 = vpop.permute.xlu2 %618  ;;  %v617_v15 = vpop.permute.xlu1 %616 }
  0xdd   :  { %v664_v40 = vsel %vm656_vm7, %v590_v48, %v617_v15  ;;  %v642_v42 = vpop.permute.xlu0 %641  ;;  %v665_v26 = vsel %vm656_vm7, %v1535_v4, %v619_v14 }
  0xde   :  { %v673_v38 = vsel %vm666_vm8, %v663_v39, %v642_v42  ;;  %v741_v42 = vlaneseq }
  0xdf   :  { %697 = vrot.lane.b32.xlu0 %v673_v38, %s1090_s16 }
  0xe4   :  { %v634_v17 = vpop.permute.xlu2 %633  ;;  %v632_v20 = vpop.permute.xlu1 %631 }
  0xe5   :  { %v669_v47 = vsel %vm666_vm8, %v659_v16, %v634_v17  ;;  %v668_v22 = vsel %vm666_vm8, %v658_v55, %v632_v20 }
  0xe6   :  { %689 = vrot.lane.b32.xlu2 %v669_v47, %s1090_s16  ;;  %687 = vrot.lane.b32.xlu1 %v668_v22, %s1090_s16 }
  0xec   :  { %v638_v50 = vpop.permute.xlu1 %637  ;;  %v640_v54 = vpop.permute.xlu2 %639 }
  0xed   :  { %v671_v36 = vsel %vm666_vm8, %v661_v31, %v638_v50  ;;  %v672_v56 = vsel %vm666_vm8, %v662_v51, %v640_v54  ;;  %v296_v51 = vadd.f32 %v1525_v61, %v1474_v29 }
  0xee   :  { %693 = vrot.lane.b32.xlu1 %v671_v36, %s1090_s16  ;;  %695 = vrot.lane.b32.xlu2 %v672_v56, %s1090_s16 }
  0xf4   :  { %v644_v41 = vpop.permute.xlu1 %643  ;;  %v646_v0 = vpop.permute.xlu2 %645 }
  0xf5   :  { %v674_v43 = vsel %vm666_vm8, %v664_v40, %v644_v41  ;;  %v675_v1 = vsel %vm666_vm8, %v665_v26, %v646_v0 }
  0xf6   :  { %699 = vrot.lane.b32.xlu1 %v674_v43, %s1090_s16  ;;  %701 = vrot.lane.b32.xlu2 %v675_v1, %s1090_s16 }
 0x108   :  { %v438_v25 = vpop.f32.mrf.mxu0 }
 0x109   :  { %v439_v30 = vadd.f32 %v1014_v24, %v438_v25 }
 0x10b   :  { %v465_v33 = vmax.f32 %v439_v30, 0.0 }
 0x10d   :  { %966 = vmatmul.msk.f32.vlgmr.msrb.gmra.mxu1 %vm393_vm6, %v465_v33 }
 0x116   :  { %v441_v45 = vpop.f32.mrf.mxu2 }
 0x117   :  { %v442_v46 = vadd.f32 %v1014_v24, %v441_v45 }
 0x119   :  { %v466_v27 = vmax.f32 %v442_v46, 0.0 }
 0x11b   :  { %967 = vmatmul.msk.f32.vlgmr.msra.gmra.mxu3 %vm393_vm6, %v466_v27  ;;  %v742_v27 = vand.u32 127, %v741_v42 }
 0x11d   :  { %vm743_vm10 = vcmp.ge.s32.totalorder %v742_v27, 12  ;;  %vm744_vm11 = vcmp.lt.s32.totalorder %v742_v27, 24 }
 0x11e   :  { %v444_v49 = vpop.f32.mrf.mxu2  ;;  %vm1614_vm13 = vmand %vm743_vm10, %vm744_vm11 }
 0x11f   :  { %v445_v19 = vadd.f32 %v1014_v24, %v444_v49 }
 0x121   :  { %v467_v52 = vmax.f32 %v445_v19, 0.0 }
 0x123   :  { %968 = vmatmul.msk.f32.gmra.mxu3 %vm393_vm6, %v467_v52 }
 0x126   :  { %v447_v58 = vpop.f32.mrf.mxu2 }
 0x127   :  { %v448_v59 = vadd.f32 %v1014_v24, %v447_v58 }
 0x129   :  { %v468_v62 = vmax.f32 %v448_v59, 0.0 }
 0x12b   :  { %969 = vmatmul.msk.f32.gmra.mxu3 %vm393_vm6, %v468_v62 }
 0x12e   :  { %v450_v21 = vpop.f32.mrf.mxu2 }
 0x12f   :  { %v451_v3 = vadd.f32 %v1014_v24, %v450_v21 }
 0x131   :  { %v469_v48 = vmax.f32 %v451_v3, 0.0 }
 0x133   :  { %970 = vmatmul.msk.f32.gmra.mxu3 %vm393_vm6, %v469_v48 }
 0x136   :  { %v453_v5 = vpop.f32.mrf.mxu2 }
 0x137   :  { %v454_v6 = vadd.f32 %v1014_v24, %v453_v5 }
 0x139   :  { %v470_v32 = vmax.f32 %v454_v6, 0.0 }
 0x13b   :  { %971 = vmatmul.msk.f32.gmra.mxu3 %vm393_vm6, %v470_v32 }
 0x13e   :  { %v456_v7 = vpop.f32.mrf.mxu2 }
 0x13f   :  { %v457_v4 = vadd.f32 %v1014_v24, %v456_v7 }
 0x140   :  { %v690_v14 = vpop.permute.xlu2 %689 }
 0x141   :  { %v471_v8 = vmax.f32 %v457_v4, 0.0  ;;  %v686_v17 = vpop.permute.xlu0 %685  ;;  %v715_v56 = vsel %vm712_vm9, 0.0, %v690_v14 }
 0x142   :  { %v713_v20 = vsel %vm712_vm9, 0.0, %v686_v17  ;;  %v725_v1 = vsel %vm722_vm0, %v715_v56, 0.0 }
 0x143   :  { %972 = vmatmul.msk.f32.gmra.mxu3 %vm393_vm6, %v471_v8  ;;  %v723_v50 = vsel %vm722_vm0, %v713_v20, 0.0 }
 0x146   :  { %v459_v9 = vpop.f32.mrf.mxu2 }
 0x147   :  { %v460_v10 = vadd.f32 %v1014_v24, %v459_v9  ;;  %v299_v9 = vadd.f32 %v1525_v61, %v1482_v34 }
 0x148   :  { %v1588_v16 = vpop.permute.xlu2 %695 }
 0x149   :  { %v472_v60 = vmax.f32 %v460_v10, 0.0  ;;  %v692_v6 = vpop.permute.xlu0 %691 }
 0x14a   :  { %v716_v10 = vsel %vm712_vm9, 0.0, %v692_v6 }
 0x14b   :  { %973 = vmatmul.msk.f32.gmra.mxu3 %vm393_vm6, %v472_v60 }
 0x14e   :  { %v462_v11 = vpop.f32.mrf.mxu2 }
 0x14f   :  { %v463_v12 = vadd.f32 %v1014_v24, %v462_v11 }
 0x150   :  { %v702_v47 = vpop.permute.xlu2 %701 }
 0x151   :  { %v473_v13 = vmax.f32 %v463_v12, 0.0  ;;  %v721_v25 = vsel %vm712_vm9, 0.0, %v702_v47  ;;  %v726_v12 = vsel %vm722_vm0, %v716_v10, 0.0  ;;  %v302_v47 = vadd.f32 %v1525_v61, %v1501_v44 }
 0x152   :  { %v1598_v30 = vsel %vm722_vm0, %v721_v25, 0.0 }
 0x153   :  { %974 = vmatmul.msk.f32.gmra.mxu3 %vm393_vm6, %v473_v13 }
 0x158   :  { %v688_v15 = vpop.permute.xlu1 %687 }
 0x159   :  { %v714_v41 = vsel %vm712_vm9, 0.0, %v688_v15 }
 0x15a   :  { %v724_v43 = vsel %vm722_vm0, %v714_v41, 0.0 }
 0x160   :  { %v1590_v55 = vpop.permute.xlu1 %693 }
 0x161   :  { %v717_v34 = vsel %vm712_vm9, 0.0, %v1590_v55  ;;  %v305_v55 = vadd.f32 %v1525_v61, %v1517_v53 }
 0x168   :  { %v700_v22 = vpop.permute.xlu1 %699 }
 0x169   :  { %v720_v24 = vsel %vm712_vm9, 0.0, %v700_v22 }
 0x16a   :  { %v1601_v31 = vsel %vm722_vm0, %v720_v24, 0.0 }
 0x18a   :  { %v530_v33 = vpop.f32.mrf.mxu1 }
 0x18b   :  { %v557_v35 = vadd.f32 %v530_v33, %v290_v28 }
 0x18d   :  { %v732_v36 = vadd.f32 %v723_v50, %v557_v35  ;;  %v727_v50 = vsel %vm722_vm0, %v717_v34, 0.0 }
 0x18f   :  { %v975_v37 = vmul.f32 -1.442695, %v732_v36 }
 0x191   :  { %1051 = vpow2.f32 %v975_v37 }
 0x197   :  { %v1052_v39 = vpop.eup %1051 }
 0x198   :  { %v773_v40 = vadd.f32 1.0, %v1052_v39 }
 0x19a   :  { %1053 = vrcp.f32 %v773_v40  ;;  %v793_v23 = vand.u32 2147483648, %v773_v40  ;;  %v791_v59 = vand.u32 2147483647, %v773_v40  ;;  %vm787_vm14 = vweird.f32 %v773_v40 }
 0x19c   :  { %v794_v21 = vor.u32 1.1754944e-38, %v793_v23  ;;  %vm792_vm1 = vcmp.eq.f32.partialorder %v791_v59, 8.507059e+37  ;;  %v698_v23 = vpop.permute.xlu0 %697 }
 0x19e   :  { %v533_v38 = vpop.f32.mrf.mxu3 }
 0x19f   :  { %v558_v45 = vadd.f32 %v533_v38, %v293_v18  ;;  %v718_v18 = vsel %vm712_vm9, 0.0, %v1588_v16 }
 0x1a0   :  { %v1054_v46 = vpop.eup %1053  ;;  %v728_v53 = vsel %vm722_vm0, %v718_v18, 0.0 }
 0x1a1   :  { %v783_v49 = vmul.f32 %v1054_v46, %v773_v40  ;;  %v1608_v19 = vadd.f32 %v724_v43, %v558_v45  ;;  %vm788_vm12 = vweird.f32 %v1054_v46 }
 0x1a2   :  { %vm789_vm15 = vmor %vm787_vm14, %vm788_vm12 }
 0x1a3   :  { %v784_v52 = vsub.f32 1.0, %v783_v49  ;;  %v976_v54 = vmul.f32 -1.442695, %v1608_v19 }
 0x1a5   :  { %v785_v58 = vmul.f32 %v1054_v46, %v784_v52  ;;  %1055 = vpow2.f32 %v976_v54 }
 0x1a6   :  { %v536_v26 = vpop.f32.mrf.mxu3 }
 0x1a7   :  { %v786_v0 = vadd.f32 %v1054_v46, %v785_v58  ;;  %v559_v29 = vadd.f32 %v536_v26, %v296_v51 }
 0x1a9   :  { %v790_v3 = vsel %vm789_vm15, %v1054_v46, %v786_v0  ;;  %v1619_v48 = vadd.f32 %v725_v1, %v559_v29  ;;  %v308_v29 = vadd.f32 %v1525_v61, %v1520_v57 }
 0x1aa   :  { %v795_v5 = vsel %vm792_vm1, %v794_v21, %v790_v3  ;;  %v719_v21 = vsel %vm712_vm9, 0.0, %v698_v23 }
 0x1ab   :  { %v1056_v32 = vpop.eup %1055  ;;  %v917_v7 = vsel %vm1614_vm13, %v795_v5, %v732_v36  ;;  %v977_v4 = vmul.f32 -1.442695, %v1619_v48  ;;  %v729_v57 = vsel %vm722_vm0, %v719_v21, 0.0 }
 0x1ac   :  { %926 = vst [vmem:[%s1723_s8] sm:$0xff] %v917_v7  ;;  %v774_v8 = vadd.f32 1.0, %v1056_v32 }
 0x1ad   :  { %1057 = vpow2.f32 %v977_v4 }
 0x1ae   :  { %1059 = vrcp.f32 %v774_v8  ;;  %v539_v60 = vpop.f32.mrf.mxu3  ;;  %v808_v33 = vand.u32 2147483648, %v774_v8  ;;  %v806_v36 = vand.u32 2147483647, %v774_v8  ;;  %vm802_vm3 = vweird.f32 %v774_v8 }
 0x1af   :  { %v560_v11 = vadd.f32 %v539_v60, %v299_v9 }
 0x1b0   :  { %v809_v42 = vor.u32 1.1754944e-38, %v808_v33  ;;  %vm807_vm5 = vcmp.eq.f32.partialorder %v806_v36, 8.507059e+37 }
 0x1b1   :  { %v1631_v13 = vadd.f32 %v726_v12, %v560_v11 }
 0x1b3   :  { %v1058_v14 = vpop.eup %1057  ;;  %v978_v15 = vmul.f32 -1.442695, %v1631_v13 }
 0x1b4   :  { %v1060_v17 = vpop.eup %1059  ;;  %v775_v20 = vadd.f32 1.0, %v1058_v14 }
 0x1b5   :  { %v798_v22 = vmul.f32 %v1060_v17, %v774_v8  ;;  %1061 = vpow2.f32 %v978_v15  ;;  %vm803_vm2 = vweird.f32 %v1060_v17 }
 0x1b6   :  { %1063 = vrcp.f32 %v775_v20  ;;  %v542_v25 = vpop.f32.mrf.mxu3  ;;  %vm804_vm4 = vmor %vm802_vm3, %vm803_vm2  ;;  %v823_v16 = vand.u32 2147483648, %v775_v20  ;;  %v821_v56 = vand.u32 2147483647, %v775_v20  ;;  %vm817_vm7 = vweird.f32 %v775_v20 }
 0x1b7   :  { %v799_v24 = vsub.f32 1.0, %v798_v22  ;;  %v561_v28 = vadd.f32 %v542_v25, %v302_v47 }
 0x1b8   :  { %v824_v1 = vor.u32 1.1754944e-38, %v823_v16  ;;  %vm822_vm10 = vcmp.eq.f32.partialorder %v821_v56, 8.507059e+37 }
 0x1b9   :  { %v800_v35 = vmul.f32 %v1060_v17, %v799_v24  ;;  %v1639_v37 = vadd.f32 %v727_v50, %v561_v28 }
 0x1bb   :  { %v1062_v39 = vpop.eup %1061  ;;  %v801_v40 = vadd.f32 %v1060_v17, %v800_v35  ;;  %v979_v44 = vmul.f32 -1.442695, %v1639_v37 }
 0x1bc   :  { %v1064_v41 = vpop.eup %1063  ;;  %v776_v43 = vadd.f32 1.0, %v1062_v39 }
 0x1bd   :  { %v805_v38 = vsel %vm804_vm4, %v1060_v17, %v801_v40  ;;  %v813_v45 = vmul.f32 %v1064_v41, %v775_v20  ;;  %1065 = vpow2.f32 %v979_v44  ;;  %vm818_vm6 = vweird.f32 %v1064_v41 }
 0x1be   :  { %v810_v46 = vsel %vm807_vm5, %v809_v42, %v805_v38  ;;  %1067 = vrcp.f32 %v776_v43  ;;  %v545_v27 = vpop.f32.mrf.mxu3  ;;  %vm819_vm8 = vmor %vm817_vm7, %vm818_vm6  ;;  %v838_v61 = vand.u32 2147483648, %v776_v43  ;;  %v836_v60 = vand.u32 2147483647, %v776_v43 }
 0x1bf   :  { %v918_v49 = vsel %vm1614_vm13, %v810_v46, %v1608_v19  ;;  %v814_v51 = vsub.f32 1.0, %v813_v45  ;;  %v562_v52 = vadd.f32 %v545_v27, %v305_v55  ;;  %vm832_vm11 = vweird.f32 %v776_v43 }
 0x1c0   :  { %927 = vst [vmem:[%s1723_s8 + $0x8] sm:$0xff] %v918_v49  ;;  %v839_v17 = vor.u32 1.1754944e-38, %v838_v61  ;;  %vm837_vm14 = vcmp.eq.f32.partialorder %v836_v60, 8.507059e+37 }
 0x1c1   :  { %v815_v54 = vmul.f32 %v1064_v41, %v814_v51  ;;  %v1653_v58 = vadd.f32 %v728_v53, %v562_v52 }
 0x1c3   :  { %v1066_v59 = vpop.eup %1065  ;;  %v816_v26 = vadd.f32 %v1064_v41, %v815_v54  ;;  %v980_v19 = vmul.f32 -1.442695, %v1653_v58 }
 0x1c4   :  { %v1068_v0 = vpop.eup %1067  ;;  %v777_v3 = vadd.f32 1.0, %v1066_v59 }
 0x1c5   :  { %v820_v5 = vsel %vm819_vm8, %v1064_v41, %v816_v26  ;;  %v828_v6 = vmul.f32 %v1068_v0, %v776_v43  ;;  %1069 = vpow2.f32 %v980_v19  ;;  %vm833_vm9 = vweird.f32 %v1068_v0 }
 0x1c6   :  { %v825_v32 = vsel %vm822_vm10, %v824_v1, %v820_v5  ;;  %1071 = vrcp.f32 %v777_v3  ;;  %v548_v7 = vpop.f32.mrf.mxu3  ;;  %vm834_vm12 = vmor %vm832_vm11, %vm833_vm9  ;;  %v853_v50 = vand.u32 2147483648, %v777_v3  ;;  %v851_v36 = vand.u32 2147483647, %v777_v3 }
 0x1c7   :  { %v919_v4 = vsel %vm1614_vm13, %v825_v32, %v1619_v48  ;;  %v829_v8 = vsub.f32 1.0, %v828_v6  ;;  %v563_v9 = vadd.f32 %v548_v7, %v308_v29  ;;  %vm847_vm15 = vweird.f32 %v777_v3 }
 0x1c8   :  { %928 = vst [vmem:[%s1723_s8 + $0x10] sm:$0xff] %v919_v4  ;;  %v854_v55 = vor.u32 1.1754944e-38, %v853_v50  ;;  %vm852_vm2 = vcmp.eq.f32.partialorder %v851_v36, 8.507059e+37 }
 0x1c9   :  { %v830_v10 = vmul.f32 %v1068_v0, %v829_v8  ;;  %v1666_v11 = vadd.f32 %v729_v57, %v563_v9 }
 0x1cb   :  { %v1070_v12 = vpop.eup %1069  ;;  %v831_v14 = vadd.f32 %v1068_v0, %v830_v10  ;;  %v981_v15 = vmul.f32 -1.442695, %v1666_v11 }
 0x1cc   :  { %v1072_v48 = vpop.eup %1071  ;;  %v778_v20 = vadd.f32 1.0, %v1070_v12 }
 0x1cd   :  { %v835_v47 = vsel %vm834_vm12, %v1068_v0, %v831_v14  ;;  %v843_v22 = vmul.f32 %v1072_v48, %v777_v3  ;;  %1073 = vpow2.f32 %v981_v15  ;;  %vm848_vm0 = vweird.f32 %v1072_v48 }
 0x1ce   :  { %v840_v34 = vsel %vm837_vm14, %v839_v17, %v835_v47  ;;  %1075 = vrcp.f32 %v778_v20  ;;  %v551_v25 = vpop.f32.mrf.mxu3  ;;  %vm849_vm1 = vmor %vm847_vm15, %vm848_vm0  ;;  %v868_v27 = vand.u32 2147483648, %v778_v20  ;;  %v866_v51 = vand.u32 2147483647, %v778_v20 }
 0x1cf   :  { %v920_v24 = vsel %vm1614_vm13, %v840_v34, %v1631_v13  ;;  %v844_v28 = vsub.f32 1.0, %v843_v22  ;;  %v564_v33 = vadd.f32 %v551_v25, %v1528_v63  ;;  %vm862_vm4 = vweird.f32 %v778_v20 }
 0x1d0   :  { %929 = vst [vmem:[%s1723_s8 + $0x18] sm:$0xff] %v920_v24  ;;  %v869_v56 = vor.u32 1.1754944e-38, %v868_v27  ;;  %vm867_vm6 = vcmp.eq.f32.partialorder %v866_v51, 8.507059e+37 }
 0x1d1   :  { %v845_v35 = vmul.f32 %v1072_v48, %v844_v28  ;;  %v1677_v39 = vadd.f32 %v1601_v31, %v564_v33 }
 0x1d3   :  { %v1074_v40 = vpop.eup %1073  ;;  %v846_v44 = vadd.f32 %v1072_v48, %v845_v35  ;;  %v982_v41 = vmul.f32 -1.442695, %v1677_v39 }
 0x1d4   :  { %v1076_v13 = vpop.eup %1075  ;;  %v779_v63 = vadd.f32 1.0, %v1074_v40 }
 0x1d5   :  { %v850_v42 = vsel %vm849_vm1, %v1072_v48, %v846_v44  ;;  %v858_v18 = vmul.f32 %v1076_v13, %v778_v20  ;;  %1077 = vpow2.f32 %v982_v41  ;;  %vm863_vm3 = vweird.f32 %v1076_v13 }
 0x1d6   :  { %v855_v43 = vsel %vm852_vm2, %v854_v55, %v850_v42  ;;  %1079 = vrcp.f32 %v779_v63  ;;  %v554_v38 = vpop.f32.mrf.mxu3  ;;  %vm864_vm5 = vmor %vm862_vm4, %vm863_vm3  ;;  %v883_v0 = vand.u32 2147483648, %v779_v63  ;;  %v881_v1 = vand.u32 2147483647, %v779_v63 }
 0x1d7   :  { %v921_v31 = vsel %vm1614_vm13, %v855_v43, %v1639_v37  ;;  %v859_v45 = vsub.f32 1.0, %v858_v18  ;;  %v565_v46 = vadd.f32 %v554_v38, %v1533_v2  ;;  %vm877_vm8 = vweird.f32 %v779_v63 }
 0x1d8   :  { %930 = vst [vmem:[%s1723_s8 + $0x20] sm:$0xff] %v921_v31  ;;  %v884_v6 = vor.u32 1.1754944e-38, %v883_v0  ;;  %vm882_vm9 = vcmp.eq.f32.partialorder %v881_v1, 8.507059e+37 }
 0x1d9   :  { %v860_v49 = vmul.f32 %v1076_v13, %v859_v45  ;;  %v1688_v52 = vadd.f32 %v1598_v30, %v565_v46 }
 0x1db   :  { %v1078_v53 = vpop.eup %1077  ;;  %v861_v16 = vadd.f32 %v1076_v13, %v860_v49  ;;  %v983_v54 = vmul.f32 -1.442695, %v1688_v52 }
 0x1dc   :  { %v1080_v37 = vpop.eup %1079  ;;  %v780_v2 = vadd.f32 1.0, %v1078_v53 }
 0x1dd   :  { %v865_v23 = vsel %vm864_vm5, %v1076_v13, %v861_v16  ;;  %v873_v59 = vmul.f32 %v1080_v37, %v779_v63  ;;  %1081 = vpow2.f32 %v983_v54  ;;  %vm878_vm7 = vweird.f32 %v1080_v37 }
 0x1de   :  { %v870_v26 = vsel %vm867_vm6, %v869_v56, %v865_v23  ;;  %1083 = vrcp.f32 %v780_v2  ;;  %vm879_vm10 = vmor %vm877_vm8, %vm878_vm7  ;;  %v898_v57 = vand.u32 2147483648, %v780_v2  ;;  %v896_v10 = vand.u32 2147483647, %v780_v2 }
 0x1df   :  { %v922_v30 = vsel %vm1614_vm13, %v870_v26, %v1653_v58  ;;  %v874_v19 = vsub.f32 1.0, %v873_v59  ;;  %vm892_vm12 = vweird.f32 %v780_v2 }
 0x1e0   :  { %931 = vst [vmem:[%s1723_s8 + $0x28] sm:$0xff] %v922_v30  ;;  %v899_v14 = vor.u32 1.1754944e-38, %v898_v57  ;;  %vm897_vm0 = vcmp.eq.f32.partialorder %v896_v10, 8.507059e+37 }
 0x1e1   :  { %v875_v29 = vmul.f32 %v1080_v37, %v874_v19 }
 0x1e3   :  { %v1082_v21 = vpop.eup %1081  ;;  %v876_v3 = vadd.f32 %v1080_v37, %v875_v29 }
 0x1e4   :  { %v1084_v5 = vpop.eup %1083  ;;  %v781_v32 = vadd.f32 1.0, %v1082_v21 }
 0x1e5   :  { %v880_v7 = vsel %vm879_vm10, %v1080_v37, %v876_v3  ;;  %v888_v4 = vmul.f32 %v1084_v5, %v780_v2  ;;  %vm893_vm11 = vweird.f32 %v1084_v5 }
 0x1e6   :  { %v885_v58 = vsel %vm882_vm9, %v884_v6, %v880_v7  ;;  %1085 = vrcp.f32 %v781_v32  ;;  %vm894_vm14 = vmor %vm892_vm12, %vm893_vm11  ;;  %v913_v47 = vand.u32 2147483648, %v781_v32  ;;  %v911_v34 = vand.u32 2147483647, %v781_v32 }
 0x1e7   :  { %v923_v8 = vsel %vm1614_vm13, %v885_v58, %v1666_v11  ;;  %v889_v9 = vsub.f32 1.0, %v888_v4  ;;  %vm907_vm1 = vweird.f32 %v781_v32 }
 0x1e8   :  { %932 = vst [vmem:[%s1723_s8 + $0x30] sm:$0xff] %v923_v8  ;;  %v914_v24 = vor.u32 1.1754944e-38, %v913_v47  ;;  %vm912_vm3 = vcmp.eq.f32.partialorder %v911_v34, 8.507059e+37 }
 0x1e9   :  { %v890_v61 = vmul.f32 %v1084_v5, %v889_v9 }
 0x1eb   :  { %v891_v60 = vadd.f32 %v1084_v5, %v890_v61 }
 0x1ec   :  { %v1086_v12 = vpop.eup %1085 }
 0x1ed   :  { %v895_v15 = vsel %vm894_vm14, %v1084_v5, %v891_v60  ;;  %v903_v48 = vmul.f32 %v1086_v12, %v781_v32  ;;  %vm908_vm15 = vweird.f32 %v1086_v12 }
 0x1ee   :  { %v900_v17 = vsel %vm897_vm0, %v899_v14, %v895_v15  ;;  %vm909_vm2 = vmor %vm907_vm1, %vm908_vm15 }
 0x1ef   :  { %v924_v11 = vsel %vm1614_vm13, %v900_v17, %v1677_v39  ;;  %v904_v20 = vsub.f32 1.0, %v903_v48 }
 0x1f0   :  { %933 = vst [vmem:[%s1723_s8 + $0x38] sm:$0xff] %v924_v11 }
 0x1f1   :  { %v905_v22 = vmul.f32 %v1086_v12, %v904_v20 }
 0x1f3   :  { %v906_v25 = vadd.f32 %v1086_v12, %v905_v22 }
 0x1f5   :  { %v910_v28 = vsel %vm909_vm2, %v1086_v12, %v906_v25 }
 0x1f6   :  { %v915_v33 = vsel %vm912_vm3, %v914_v24, %v910_v28 }
 0x1f7   :  { %v925_v50 = vsel %vm1614_vm13, %v915_v33, %v1688_v52 }
 0x1f8   :  { %934 = vst [vmem:[%s1723_s8 + $0x40] sm:$0xff] %v925_v50 }

// kernel: dab_deformable_detr_forward.2
= control target key start
LH: loop header
LB: loop body
LE: loop exit
PB: predicated region body
PF: predicated region fallthrough
CT: control target
= control target key end

     0   :  { %v817_v0 = vmov 0   ;;  %vm64_vm0 = vcmask 64512   ;;  %vm416_vm1 = vcmask 130048   ;;  %vm114_vm2 = vcmask 523264   ;;  %s1400_s5 = inlined_call_operand.vmem [shape: f32[16,32], index: 5, kind: input, shape index: {}]   ;;  %s1401_s2 = inlined_call_operand.vmem [shape: f32[32,1], index: 2, kind: input, shape index: {}]   ;;  %s1402_s0 = inlined_call_operand.vmem [shape: f32[8,128], index: 0, kind: input, shape index: {}]   ;;  %s1403_s1 = inlined_call_operand.vmem [shape: f32[32,8], index: 1, kind: input, shape index: {}]   ;;  %s1404_s6 = inlined_call_operand.vmem [shape: f32[32,16], index: 6, kind: input, shape index: {}]   ;;  %s1405_s3 = inlined_call_operand.vmem [shape: f32[32,1], index: 3, kind: input, shape index: {}]   ;;  %s1406_s4 = inlined_call_operand.vmem [shape: f32[32,1], index: 4, kind: input, shape index: {}]   ;;  %s1407_s7 = inlined_call_operand.vmem [shape: f32[32,1], index: 7, kind: input, shape index: {}]   ;;  %s1408_s8 = inlined_call_operand.vmem [shape: f32[32,1], index: 8, kind: input, shape index: {}]   ;;  %s1409_s9 = inlined_call_operand.vmem [shape: f32[32,1], index: 9, kind: input, shape index: {}]   ;;  %s1410_s10 = inlined_call_operand.vmem [shape: f32[32,256], index: 10, kind: output, shape index: {}]  }
   0x1   :  { %779 = vset.pattern.permute.xlu1 %v817_v0  ;;  %778 = vset.pattern.permute.xlu0 %v817_v0  ;;  %v391_v1 = vld [vmem:[%s1400_s5 + $0x8] sm:$0xff]  ;;  %v42_v2 = vld [vmem:[%s1401_s2 + $0x10] sm:$0xff]  ;;  %v40_v3 = vld [vmem:[%s1401_s2] sm:$0xff] }
   0x2   :  { %443 = vmatpush.msra.mxu1 %v391_v1  ;;  %56 = vperm.xlu1 %779, %v42_v2   ;;  %v39_v4 = vld [vmem:[%s1402_s0] sm:$0xff]  ;;  %v36_v6 = vld [vmem:[%s1403_s1 + $0x8] sm:$0xff]  ;;  %v388_v9 = vld [vmem:[%s1404_s6 + $0x10] sm:$0xff] }
   0x3   :  { %v35_v5 = vld [vmem:[%s1403_s1] sm:$0xff]  ;;  %46 = vperm.xlu0 %778, %v40_v3   ;;  %92 = vmatpush.msra.mxu0 %v39_v4  ;;  %v43_v11 = vld [vmem:[%s1401_s2 + $0x18] sm:$0xff]  ;;  %v41_v12 = vld [vmem:[%s1401_s2 + $0x8] sm:$0xff] }
   0x4   :  { %v390_v7 = vld [vmem:[%s1400_s5] sm:$0xff]  ;;  %770 = vmatpush.msra.mxu3 %v39_v4  ;;  %762 = vmatmul.msk.f32.vlgmr.msra.gmra.mxu0 %vm64_vm0, %v35_v5  ;;  %v37_v13 = vld [vmem:[%s1403_s1 + $0x10] sm:$0xff]  ;;  %v387_v14 = vld [vmem:[%s1404_s6 + $0x8] sm:$0xff] }
   0x5   :  { %v386_v8 = vld [vmem:[%s1404_s6] sm:$0xff]  ;;  %763 = vmatmul.msk.f32.vlgmr.msra.gmra.mxu3 %vm64_vm0, %v36_v6  ;;  %444 = vmatpush.msra.mxu1 %v390_v7  ;;  %v109_v15 = vld [vmem:[%s1405_s3 + $0x18] sm:$0xff]  ;;  %v108_v17 = vld [vmem:[%s1405_s3 + $0x10] sm:$0xff] }
   0x6   :  { %766 = vmatmul.msk.f32.vlgmr.msra.gmra.mxu1 %vm416_vm1, %v386_v8  ;;  %771 = vmatpush.msra.mxu2 %v391_v1  ;;  %v106_v10 = vld [vmem:[%s1405_s3] sm:$0xff]  ;;  %v389_v16 = vld [vmem:[%s1404_s6 + $0x18] sm:$0xff]  ;;  %v107_v18 = vld [vmem:[%s1405_s3 + $0x8] sm:$0xff] }
   0x7   :  { %780 = vset.pattern.permute.xlu2 %v817_v0  ;;  %v111_v19 = vld [vmem:[%s1406_s4 + $0x8] sm:$0xff]  ;;  %v112_v20 = vld [vmem:[%s1406_s4 + $0x10] sm:$0xff]  ;;  %v110_v21 = vld [vmem:[%s1406_s4] sm:$0xff] }
   0x8   :  { %772 = vmatpush.msra.mxu2 %v390_v7  ;;  %212 = vperm.xlu2 %780, %v106_v10   ;;  %v38_v22 = vld [vmem:[%s1403_s1 + $0x18] sm:$0xff]  ;;  %v393_v23 = vld [vmem:[%s1407_s7 + $0x8] sm:$0xff]  ;;  %v394_v24 = vld [vmem:[%s1407_s7 + $0x10] sm:$0xff] }
   0x9   :  { %768 = vmatmul.msk.f32.vlgmr.msra.gmra.mxu2 %vm416_vm1, %v388_v9  ;;  %v113_v25 = vld [vmem:[%s1406_s4 + $0x18] sm:$0xff]  ;;  %v458_v26 = vld [vmem:[%s1408_s8] sm:$0xff]  ;;  %v459_v27 = vld [vmem:[%s1408_s8 + $0x8] sm:$0xff] }
   0xa   :  { %61 = vperm.xlu1 %779, %v43_v11   ;;  %v392_v28 = vld [vmem:[%s1407_s7] sm:$0xff]  ;;  %v461_v29 = vld [vmem:[%s1408_s8 + $0x18] sm:$0xff]  ;;  %v460_v32 = vld [vmem:[%s1408_s8 + $0x10] sm:$0xff]  ;;  %s819_s8 = smov 112  }
   0xb   :  { %51 = vperm.xlu0 %778, %v41_v12   ;;  %v462_v30 = vld [vmem:[%s1409_s9] sm:$0xff]  ;;  %v395_v31 = vld [vmem:[%s1407_s7 + $0x18] sm:$0xff]  ;;  %s818_s7 = smov 64  }
   0xd   :  { %764 = vmatmul.msk.f32.gmra.mxu3 %vm64_vm0, %v37_v13 }
   0xe   :  { %767 = vmatmul.msk.f32.gmra.mxu1 %vm416_vm1, %v387_v14 }
  0x10   :  { %227 = vperm.xlu2 %780, %v109_v15  }
  0x11   :  { %769 = vmatmul.msk.f32.gmra.mxu2 %vm416_vm1, %v389_v16 }
  0x12   :  { %222 = vperm.xlu1 %779, %v108_v17   ;;  %v820_v17 = vmov 64.0  }
  0x13   :  { %217 = vperm.xlu0 %778, %v107_v18   ;;  %781 = vrcp.f32 %v820_v17 }
  0x15   :  { %765 = vmatmul.msk.f32.gmra.mxu3 %vm64_vm0, %v38_v22 }
  0x18   :  { %241 = vperm.xlu2 %780, %v111_v19  }
  0x19   :  { %v782_v19 = vpop.eup %781 }
  0x1a   :  { %246 = vperm.xlu1 %779, %v112_v20   ;;  %vm132_vm3 = vweird.f32 %v782_v19 }
  0x1b   :  { %236 = vperm.xlu0 %778, %v110_v21   ;;  %v128_v21 = vmul.f32 64.0, %v782_v19 }
  0x20   :  { %403 = vperm.xlu2 %780, %v393_v23  }
  0x22   :  { %408 = vperm.xlu1 %779, %v394_v24   ;;  %v129_v24 = vsub.f32 1.0, %v128_v21 }
  0x23   :  { %251 = vperm.xlu0 %778, %v113_v25  }
  0x28   :  { %563 = vperm.xlu2 %780, %v458_v26   ;;  %v130_v26 = vmul.f32 %v782_v19, %v129_v24 }
  0x2a   :  { %568 = vperm.xlu1 %779, %v459_v27  }
  0x2b   :  { %398 = vperm.xlu0 %778, %v392_v28   ;;  %v131_v28 = vadd.f32 %v782_v19, %v130_v26 }
  0x30   :  { %578 = vperm.xlu2 %780, %v461_v29   ;;  %v1059_v29 = vsel %vm132_vm3, %v782_v19, %v131_v28 }
  0x32   :  { %587 = vperm.xlu1 %779, %v462_v30  }
  0x33   :  { %413 = vperm.xlu0 %778, %v395_v31  }
  0x3b   :  { %573 = vperm.xlu0 %778, %v460_v32  }
  0x62   :  { %v981_v33 = vpop.permute.xlu2 %212 }
  0x6a   :  { %v983_v35 = vpop.permute.xlu2 %227 }
  0x72   :  { %v985_v38 = vpop.permute.xlu2 %241 }
  0x74   :  { %v57_v34 = vpop.permute.xlu1 %56 }
  0x75   :  { %v47_v37 = vpop.permute.xlu0 %46 }
  0x7a   :  { %v404_v46 = vpop.permute.xlu2 %403 }
  0x7c   :  { %v62_v36 = vpop.permute.xlu1 %61 }
  0x7d   :  { %v52_v43 = vpop.permute.xlu0 %51 }
  0x81   :  { %v94_v39 = vpop.f32.mrf.mxu0 }
  0x82   :  { %v987_v40 = vadd.f32 %v94_v39, %v47_v37  ;;  %v1035_v6 = vpop.permute.xlu2 %563 }
  0x83   :  { %v446_v41 = vpop.f32.mrf.mxu1 }
  0x84   :  { %262 = vrot.lane.b32.xlu2 %v987_v40, %s818_s7  ;;  %v991_v42 = vpop.permute.xlu1 %222  ;;  %v115_v58 = vsel %vm114_vm2, %v987_v40, 0.0 }
  0x85   :  { %v1011_v55 = vpop.permute.xlu0 %217 }
  0x88   :  { %v97_v44 = vpop.f32.mrf.mxu3 }
  0x89   :  { %v993_v45 = vadd.f32 %v97_v44, %v52_v43 }
  0x8a   :  { %v1037_v7 = vpop.permute.xlu2 %578 }
  0x8b   :  { %264 = vrot.lane.b32.xlu1 %v993_v45, %s818_s7  ;;  %v449_v47 = vpop.f32.mrf.mxu1  ;;  %v118_v11 = vsel %vm114_vm2, %v993_v45, 0.0 }
  0x8c   :  { %v997_v48 = vadd.f32 %v449_v47, %v404_v46  ;;  %v999_v49 = vpop.permute.xlu1 %246  ;;  %v452_v52 = vpop.f32.mrf.mxu2 }
  0x8d   :  { %v1013_v56 = vpop.permute.xlu0 %236 }
  0x8e   :  { %615 = vrot.lane.b32.xlu0 %v997_v48, %s819_s8  ;;  %v469_v0 = vsel %vm416_vm1, %v997_v48, 0.0 }
  0x90   :  { %v100_v50 = vpop.f32.mrf.mxu3 }
  0x91   :  { %v1003_v51 = vadd.f32 %v100_v50, %v57_v34 }
  0x93   :  { %v121_v60 = vsel %vm114_vm2, %v1003_v51, 0.0 }
  0x94   :  { %v409_v53 = vpop.permute.xlu1 %408  ;;  %v455_v62 = vpop.f32.mrf.mxu2 }
  0x95   :  { %v1005_v54 = vadd.f32 %v452_v52, %v409_v53  ;;  %v1015_v57 = vpop.permute.xlu0 %251 }
  0x96   :  { %266 = vrot.lane.b32.xlu0 %v1003_v51, %s818_s7 }
  0x97   :  { %617 = vrot.lane.b32.xlu1 %v1005_v54, %s819_s8  ;;  %v472_v13 = vsel %vm416_vm1, %v1005_v54, 0.0 }
  0x98   :  { %v103_v61 = vpop.f32.mrf.mxu3 }
  0x99   :  { %v1023_v1 = vadd.f32 %v103_v61, %v62_v36  ;;  %v821_v36 = vmov 16.0  }
  0x9a   :  { %783 = vrcp.f32 %v821_v36 }
  0x9b   :  { %v124_v4 = vsel %vm114_vm2, %v1023_v1, 0.0 }
  0x9c   :  { %v1051_v16 = vpop.permute.xlu1 %568 }
  0x9d   :  { %v399_v59 = vpop.permute.xlu0 %398 }
  0x9e   :  { %v1025_v2 = vadd.f32 %v446_v41, %v399_v59 }
  0xa0   :  { %v466_v10 = vsel %vm416_vm1, %v1025_v2, 0.0  ;;  %v784_v39 = vpop.eup %783 }
  0xa1   :  { %v479_v43 = vmul.f32 16.0, %v784_v39  ;;  %vm483_vm4 = vweird.f32 %v784_v39 }
  0xa3   :  { %v480_v44 = vsub.f32 1.0, %v479_v43 }
  0xa4   :  { %v1055_v20 = vpop.permute.xlu1 %587 }
  0xa5   :  { %v414_v63 = vpop.permute.xlu0 %413  ;;  %v481_v46 = vmul.f32 %v784_v39, %v480_v44 }
  0xa6   :  { %v1027_v3 = vadd.f32 %v455_v62, %v414_v63 }
  0xa7   :  { %v482_v47 = vadd.f32 %v784_v39, %v481_v46 }
  0xa8   :  { %v475_v5 = vsel %vm416_vm1, %v1027_v3, 0.0 }
  0xa9   :  { %v1069_v50 = vsel %vm483_vm4, %v784_v39, %v482_v47 }
  0xad   :  { %116 = vadd.xlane.f32.xlu2 %v115_v58  ;;  %v1044_v12 = vpop.permute.xlu0 %573 }
  0xc0   :  { %122 = vadd.xlane.f32.xlu0 %v121_v60 }
  0xc1   :  { %470 = vadd.xlane.f32.xlu1 %v469_v0 }
  0xc5   :  { %613 = vrot.lane.b32.xlu2 %v1025_v2, %s819_s8 }
  0xc8   :  { %476 = vadd.xlane.f32.xlu0 %v475_v5 }
  0xc9   :  { %125 = vadd.xlane.f32.xlu1 %v124_v4 }
  0xde   :  { %v263_v8 = vpop.permute.xlu2 %262 }
  0xdf   :  { %v274_v9 = vsel %vm114_vm2, %v263_v8, 0.0 }
  0xe0   :  { %275 = vadd.xlane.f32.xlu1 %v274_v9 }
  0xee   :  { %467 = vadd.xlane.f32.xlu2 %v466_v10 }
  0xf6   :  { %119 = vadd.xlane.f32.xlu2 %v118_v11 }
  0xfd   :  { %v265_v25 = vpop.permute.xlu1 %264 }
  0xfe   :  { %473 = vadd.xlane.f32.xlu2 %v472_v13  ;;  %v277_v27 = vsel %vm114_vm2, %v265_v25, 0.0 }
 0x100   :  { %v616_v14 = vpop.permute.xlu0 %615 }
 0x101   :  { %v628_v15 = vsel %vm416_vm1, %v616_v14, 0.0 }
 0x102   :  { %629 = vadd.xlane.f32.xlu1 %v628_v15 }
 0x108   :  { %v267_v59 = vpop.permute.xlu0 %266 }
 0x109   :  { %v618_v37 = vpop.permute.xlu1 %617  ;;  %v280_v15 = vsel %vm114_vm2, %v267_v59, 0.0 }
 0x10a   :  { %v631_v41 = vsel %vm416_vm1, %v618_v37, 0.0 }
 0x116   :  { %619 = vrot.lane.b32.xlu2 %v1027_v3, %s819_s8 }
 0x11e   :  { %268 = vrot.lane.b32.xlu2 %v1023_v1, %s818_s7 }
 0x120   :  { %v117_v18 = vpop.xlane.xlu2 %116 }
 0x121   :  { %v134_v30 = vmul.f32 %v1059_v29, %v117_v18 }
 0x123   :  { %v1063_v31 = vsub.f32 %v987_v40, %v134_v30 }
 0x125   :  { %v142_v32 = vmul.f32 %v1063_v31, %v1063_v31 }
 0x127   :  { %v146_v34 = vsel %vm114_vm2, %v142_v32, 0.0 }
 0x128   :  { %v614_v22 = vpop.permute.xlu2 %613 }
 0x129   :  { %v625_v23 = vsel %vm416_vm1, %v614_v22, 0.0 }
 0x12a   :  { %626 = vadd.xlane.f32.xlu0 %v625_v23 }
 0x132   :  { %278 = vadd.xlane.f32.xlu0 %v277_v27 }
 0x133   :  { %v123_v5 = vpop.xlane.xlu0 %122 }
 0x134   :  { %v471_v9 = vpop.xlane.xlu1 %470  ;;  %v136_v22 = vmul.f32 %v1059_v29, %v123_v5 }
 0x135   :  { %v486_v11 = vmul.f32 %v1069_v50, %v471_v9 }
 0x136   :  { %v1102_v26 = vsub.f32 %v1003_v51, %v136_v22 }
 0x137   :  { %v1088_v14 = vsub.f32 %v997_v48, %v486_v11 }
 0x138   :  { %v144_v39 = vmul.f32 %v1102_v26, %v1102_v26 }
 0x139   :  { %v494_v23 = vmul.f32 %v1088_v14, %v1088_v14 }
 0x13a   :  { %v152_v44 = vsel %vm114_vm2, %v144_v39, 0.0 }
 0x13b   :  { %v477_v21 = vpop.xlane.xlu0 %476  ;;  %v500_v27 = vsel %vm416_vm1, %v494_v23, 0.0 }
 0x13c   :  { %v488_v24 = vmul.f32 %v1069_v50, %v477_v21  ;;  %v126_v28 = vpop.xlane.xlu1 %125 }
 0x13d   :  { %v137_v37 = vmul.f32 %v1059_v29, %v126_v28 }
 0x13e   :  { %v1106_v32 = vsub.f32 %v1027_v3, %v488_v24 }
 0x13f   :  { %v1116_v43 = vsub.f32 %v1023_v1, %v137_v37 }
 0x141   :  { %v145_v47 = vmul.f32 %v1116_v43, %v1116_v43 }
 0x147   :  { %147 = vadd.xlane.f32.xlu2 %v146_v34 }
 0x14f   :  { %632 = vadd.xlane.f32.xlu2 %v631_v41  ;;  %v496_v41 = vmul.f32 %v1106_v32, %v1106_v32 }
 0x151   :  { %v506_v46 = vsel %vm416_vm1, %v496_v41, 0.0 }
 0x161   :  { %v468_v52 = vpop.xlane.xlu2 %467 }
 0x162   :  { %v485_v53 = vmul.f32 %v1069_v50, %v468_v52  ;;  %v276_v52 = vpop.xlane.xlu1 %275 }
 0x164   :  { %v1073_v58 = vsub.f32 %v1025_v2, %v485_v53  ;;  %v155_v53 = vsel %vm114_vm2, %v145_v47, 0.0 }
 0x166   :  { %v493_v60 = vmul.f32 %v1073_v58, %v1073_v58 }
 0x168   :  { %v497_v61 = vsel %vm416_vm1, %v493_v60, 0.0 }
 0x169   :  { %498 = vadd.xlane.f32.xlu1 %v497_v61  ;;  %v120_v62 = vpop.xlane.xlu2 %119 }
 0x16a   :  { %v135_v63 = vmul.f32 %v1059_v29, %v120_v62 }
 0x16c   :  { %v1080_v0 = vsub.f32 %v993_v45, %v135_v63 }
 0x16e   :  { %v143_v4 = vmul.f32 %v1080_v0, %v1080_v0 }
 0x170   :  { %v149_v8 = vsel %vm114_vm2, %v143_v4, 0.0  ;;  %v286_v4 = vmul.f32 %v276_v52, %v1059_v29 }
 0x171   :  { %150 = vadd.xlane.f32.xlu2 %v149_v8  ;;  %v474_v10 = vpop.xlane.xlu2 %473 }
 0x172   :  { %v487_v13 = vmul.f32 %v1069_v50, %v474_v10  ;;  %v1137_v10 = vsub.f32 %v987_v40, %v286_v4 }
 0x174   :  { %v1092_v18 = vsub.f32 %v1005_v54, %v487_v13 }
 0x175   :  { %v630_v59 = vpop.xlane.xlu1 %629 }
 0x176   :  { %v495_v25 = vmul.f32 %v1092_v18, %v1092_v18  ;;  %v638_v60 = vmul.f32 %v630_v59, %v1069_v50 }
 0x178   :  { %v503_v34 = vsel %vm416_vm1, %v495_v25, 0.0  ;;  %v1125_v62 = vsub.f32 %v997_v48, %v638_v60 }
 0x179   :  { %281 = vadd.xlane.f32.xlu2 %v280_v15  ;;  %v620_v17 = vpop.permute.xlu2 %619 }
 0x17a   :  { %v634_v19 = vsel %vm416_vm1, %v620_v17, 0.0  ;;  %v646_v9 = vmul.f32 %v1125_v62, %v1125_v62 }
 0x17b   :  { %635 = vadd.xlane.f32.xlu0 %v634_v19 }
 0x181   :  { %501 = vadd.xlane.f32.xlu2 %v500_v27  ;;  %v269_v30 = vpop.permute.xlu2 %268 }
 0x182   :  { %v283_v36 = vsel %vm114_vm2, %v269_v30, 0.0 }
 0x183   :  { %504 = vadd.xlane.f32.xlu0 %v503_v34  ;;  %284 = vadd.xlane.f32.xlu1 %v283_v36 }
 0x189   :  { %153 = vadd.xlane.f32.xlu2 %v152_v44  ;;  %v463_v44 = vld [vmem:[%s1409_s9 + $0x8] sm:$0xff] }
 0x18b   :  { %507 = vadd.xlane.f32.xlu1 %v506_v46 }
 0x191   :  { %156 = vadd.xlane.f32.xlu2 %v155_v53 }
 0x19d   :  { %v627_v61 = vpop.xlane.xlu0 %626 }
 0x19e   :  { %v637_v63 = vmul.f32 %v627_v61, %v1069_v50 }
 0x1a0   :  { %v1130_v5 = vsub.f32 %v1025_v2, %v637_v63  ;;  %v294_v2 = vmul.f32 %v1137_v10, %v1137_v10 }
 0x1a2   :  { %v645_v8 = vmul.f32 %v1130_v5, %v1130_v5 }
 0x1a4   :  { %653 = vrot.lane.b32.xlu0 %v645_v8, %s819_s8  ;;  %655 = vrot.lane.b32.xlu1 %v646_v9, %s819_s8 }
 0x1a5   :  { %v279_v48 = vpop.xlane.xlu0 %278 }
 0x1a6   :  { %v287_v11 = vmul.f32 %v279_v48, %v1059_v29 }
 0x1a8   :  { %v1145_v13 = vsub.f32 %v993_v45, %v287_v11 }
 0x1a9   :  { %302 = vrot.lane.b32.xlu2 %v294_v2, %s818_s7 }
 0x1aa   :  { %v295_v15 = vmul.f32 %v1145_v13, %v1145_v13 }
 0x1ac   :  { %304 = vrot.lane.b32.xlu0 %v295_v15, %s818_s7 }
 0x1ba   :  { %v148_v40 = vpop.xlane.xlu2 %147 }
 0x1c2   :  { %v633_v17 = vpop.xlane.xlu2 %632 }
 0x1c3   :  { %v639_v19 = vmul.f32 %v633_v17, %v1069_v50  ;;  %v465_v17 = vld [vmem:[%s1409_s9 + $0x18] sm:$0xff] }
 0x1c5   :  { %v1153_v21 = vsub.f32 %v1005_v54, %v639_v19 }
 0x1c7   :  { %v647_v22 = vmul.f32 %v1153_v21, %v1153_v21 }
 0x1c9   :  { %657 = vrot.lane.b32.xlu0 %v647_v22, %s819_s8 }
 0x1dc   :  { %v499_v25 = vpop.xlane.xlu1 %498 }
 0x1e4   :  { %v151_v45 = vpop.xlane.xlu2 %150 }
 0x1ec   :  { %v282_v23 = vpop.xlane.xlu2 %281 }
 0x1ed   :  { %v288_v24 = vmul.f32 %v282_v23, %v1059_v29 }
 0x1ee   :  { %v636_v27 = vpop.xlane.xlu0 %635 }
 0x1ef   :  { %v1160_v28 = vsub.f32 %v1003_v51, %v288_v24  ;;  %v640_v30 = vmul.f32 %v636_v27, %v1069_v50  ;;  %v158_v27 = vmul.f32 %v148_v40, %v1059_v29 }
 0x1f1   :  { %v1164_v34 = vsub.f32 %v1027_v3, %v640_v30  ;;  %v296_v54 = vmul.f32 %v1160_v28, %v1160_v28  ;;  %v162_v30 = vadd.f32 1e-05, %v158_v27 }
 0x1f3   :  { %306 = vrot.lane.b32.xlu1 %v296_v54, %s818_s7  ;;  %v648_v36 = vmul.f32 %v1164_v34, %v1164_v34  ;;  %v509_v54 = vmul.f32 %v499_v25, %v1069_v50  ;;  %785 = vrsqrt.f32 %v162_v30  ;;  %vm172_vm6 = vweird.f32 %v162_v30 }
 0x1f4   :  { %v502_v41 = vpop.xlane.xlu2 %501 }
 0x1f5   :  { %659 = vrot.lane.b32.xlu2 %v648_v36, %s819_s8  ;;  %v513_v36 = vadd.f32 1e-05, %v509_v54 }
 0x1f6   :  { %v285_v37 = vpop.xlane.xlu1 %284  ;;  %v1186_v52 = vpop.xlane.xlu0 %504 }
 0x1f7   :  { %v289_v39 = vmul.f32 %v285_v37, %v1059_v29  ;;  %787 = vrsqrt.f32 %v513_v36  ;;  %vm523_vm9 = vweird.f32 %v513_v36 }
 0x1f9   :  { %v1174_v51 = vsub.f32 %v1023_v1, %v289_v39  ;;  %v786_v37 = vpop.eup %785  ;;  %v159_v39 = vmul.f32 %v151_v45, %v1059_v29 }
 0x1fa   :  { %vm173_vm5 = vweird.f32 %v786_v37 }
 0x1fb   :  { %v297_v3 = vmul.f32 %v1174_v51, %v1174_v51  ;;  %vm1224_vm7 = vmor %vm172_vm6, %vm173_vm5 }
 0x1fc   :  { %v1182_v46 = vpop.xlane.xlu2 %153 }
 0x1fd   :  { %308 = vrot.lane.b32.xlu0 %v297_v3, %s818_s7  ;;  %v167_v3 = vmul.f32 %v786_v37, %v162_v30 }
 0x1fe   :  { %v1188_v1 = vpop.xlane.xlu1 %507 }
 0x1ff   :  { %v168_v40 = vmul.f32 %v786_v37, %v167_v3 }
 0x204   :  { %v1184_v47 = vpop.xlane.xlu2 %156 }
 0x205   :  { %592 = vperm.xlu0 %778, %v463_v44   ;;  %v510_v44 = vmul.f32 %v502_v41, %v1069_v50 }
 0x20c   :  { %v303_v59 = vpop.permute.xlu2 %302 }
 0x20d   :  { %v314_v60 = vsel %vm114_vm2, %v303_v59, 0.0  ;;  %v1205_v59 = vadd.f32 1e-05, %v159_v39 }
 0x20f   :  { %789 = vrsqrt.f32 %v1205_v59  ;;  %vm182_vm12 = vweird.f32 %v1205_v59 }
 0x216   :  { %v654_v53 = vpop.permute.xlu0 %653  ;;  %v656_v63 = vpop.permute.xlu1 %655 }
 0x217   :  { %v665_v61 = vsel %vm416_vm1, %v654_v53, 0.0  ;;  %v668_v8 = vsel %vm416_vm1, %v656_v63, 0.0  ;;  %v788_v53 = vpop.eup %787  ;;  %v169_v63 = vmul.f32 0.5, %v168_v40 }
 0x218   :  { %v518_v25 = vmul.f32 %v788_v53, %v513_v36  ;;  %v1214_v41 = vpop.eup %789  ;;  %vm524_vm8 = vweird.f32 %v788_v53 }
 0x219   :  { %vm525_vm10 = vmor %vm523_vm9, %vm524_vm8  ;;  %vm183_vm13 = vweird.f32 %v1214_v41 }
 0x21a   :  { %v519_v45 = vmul.f32 %v788_v53, %v518_v25  ;;  %vm1255_vm6 = vmor %vm182_vm12, %vm183_vm13  ;;  %vm745_vm12 = vcmask 261120  }
 0x21d   :  { %315 = vadd.xlane.f32.xlu1 %v314_v60  ;;  %v464_v60 = vld [vmem:[%s1409_s9 + $0x10] sm:$0xff] }
 0x21e   :  { %666 = vadd.xlane.f32.xlu2 %v665_v61  ;;  %v305_v4 = vpop.permute.xlu0 %304  ;;  %v1210_v61 = vadd.f32 1e-05, %v510_v44 }
 0x21f   :  { %v317_v9 = vsel %vm114_vm2, %v305_v4, 0.0 }
 0x220   :  { %791 = vrsqrt.f32 %v1210_v61 }
 0x225   :  { %669 = vadd.xlane.f32.xlu1 %v668_v8  ;;  %v170_v8 = vsub.f32 1.5, %v169_v63 }
 0x226   :  { %318 = vadd.xlane.f32.xlu2 %v317_v9 }
 0x23b   :  { %v658_v19 = vpop.permute.xlu0 %657 }
 0x23c   :  { %v671_v22 = vsel %vm416_vm1, %v658_v19, 0.0  ;;  %v177_v19 = vmul.f32 %v1214_v41, %v1205_v59 }
 0x23e   :  { %v178_v39 = vmul.f32 %v1214_v41, %v177_v19 }
 0x24f   :  { %v660_v48 = vpop.permute.xlu2 %659 }
 0x250   :  { %v674_v11 = vsel %vm416_vm1, %v660_v48, 0.0 }
 0x251   :  { %675 = vadd.xlane.f32.xlu2 %v674_v11  ;;  %v520_v11 = vmul.f32 0.5, %v519_v45 }
 0x265   :  { %v307_v2 = vpop.permute.xlu1 %306 }
 0x266   :  { %v320_v15 = vsel %vm114_vm2, %v307_v2, 0.0 }
 0x267   :  { %321 = vadd.xlane.f32.xlu0 %v320_v15  ;;  %v1218_v15 = vpop.eup %791 }
 0x268   :  { %v528_v27 = vmul.f32 %v1218_v15, %v1210_v61  ;;  %vm534_vm4 = vweird.f32 %v1218_v15 }
 0x269   :  { %602 = vperm.xlu2 %780, %v465_v17  }
 0x26a   :  { %v529_v63 = vmul.f32 %v1218_v15, %v528_v27 }
 0x26f   :  { %v309_v23 = vpop.permute.xlu0 %308  ;;  %672 = vadd.xlane.f32.xlu0 %v671_v22 }
 0x270   :  { %v323_v24 = vsel %vm114_vm2, %v309_v23, 0.0  ;;  %v171_v23 = vmul.f32 %v786_v37, %v170_v8 }
 0x271   :  { %324 = vadd.xlane.f32.xlu1 %v323_v24  ;;  %v521_v24 = vsub.f32 1.5, %v520_v11 }
 0x272   :  { %v175_v44 = vsel %vm1224_vm7, %v786_v37, %v171_v23  ;;  %v530_v23 = vmul.f32 0.5, %v529_v63  ;;  %vm533_vm7 = vweird.f32 %v1210_v61 }
 0x273   :  { %v522_v25 = vmul.f32 %v788_v53, %v521_v24  ;;  %v206_v37 = vmul.f32 %v175_v44, %v1063_v31  ;;  %vm1267_vm8 = vmor %vm533_vm7, %vm534_vm4 }
 0x275   :  { %v526_v19 = vsel %vm525_vm10, %v788_v53, %v522_v25 }
 0x276   :  { %v557_v36 = vmul.f32 %v526_v19, %v1073_v58 }
 0x28a   :  { %597 = vperm.xlu1 %779, %v464_v60  }
 0x290   :  { %v316_v4 = vpop.xlane.xlu1 %315 }
 0x291   :  { %v326_v9 = vmul.f32 %v316_v4, %v1059_v29  ;;  %v667_v48 = vpop.xlane.xlu2 %666 }
 0x292   :  { %v677_v2 = vmul.f32 %v667_v48, %v1069_v50 }
 0x293   :  { %v330_v17 = vadd.f32 1e-05, %v326_v9  ;;  %v179_v9 = vmul.f32 0.5, %v178_v39 }
 0x294   :  { %v681_v22 = vadd.f32 1e-05, %v677_v2 }
 0x295   :  { %793 = vrsqrt.f32 %v330_v17  ;;  %v180_v54 = vsub.f32 1.5, %v179_v9  ;;  %vm340_vm15 = vweird.f32 %v330_v17  ;;  %v581_v9 = vmul.f32 %v1035_v6, %v557_v36 }
 0x296   :  { %795 = vrsqrt.f32 %v681_v22  ;;  %vm691_vm3 = vweird.f32 %v681_v22 }
 0x297   :  { %v181_v25 = vmul.f32 %v1214_v41, %v180_v54  ;;  %v605_v59 = vadd.f32 %v1055_v20, %v581_v9 }
 0x298   :  { %v670_v3 = vpop.xlane.xlu1 %669 }
 0x299   :  { %v678_v60 = vmul.f32 %v670_v3, %v1069_v50  ;;  %v319_v40 = vpop.xlane.xlu2 %318  ;;  %v185_v54 = vsel %vm1255_vm6, %v1214_v41, %v181_v25 }
 0x29a   :  { %v327_v45 = vmul.f32 %v319_v40, %v1059_v29  ;;  %v531_v40 = vsub.f32 1.5, %v530_v23 }
 0x29b   :  { %v794_v30 = vpop.eup %793  ;;  %v1234_v4 = vadd.f32 1e-05, %v678_v60  ;;  %v230_v60 = vmul.f32 %v981_v33, %v206_v37 }
 0x29c   :  { %v796_v8 = vpop.eup %795  ;;  %v335_v48 = vmul.f32 %v794_v30, %v330_v17  ;;  %v1236_v11 = vadd.f32 1e-05, %v327_v45  ;;  %vm341_vm11 = vweird.f32 %v794_v30 }
 0x29d   :  { %v686_v2 = vmul.f32 %v796_v8, %v681_v22  ;;  %797 = vrsqrt.f32 %v1234_v4  ;;  %vm692_vm14 = vweird.f32 %v796_v8  ;;  %vm342_vm0 = vmor %vm340_vm15, %vm341_vm11  ;;  %v254_v36 = vadd.f32 %v1013_v56, %v230_v60 }
 0x29e   :  { %v336_v24 = vmul.f32 %v794_v30, %v335_v48  ;;  %799 = vrsqrt.f32 %v1236_v11  ;;  %vm693_vm5 = vmor %vm691_vm3, %vm692_vm14  ;;  %vm701_vm11 = vweird.f32 %v1234_v4  ;;  %vm350_vm14 = vweird.f32 %v1236_v11 }
 0x29f   :  { %v687_v27 = vmul.f32 %v796_v8, %v686_v2  ;;  %v532_v2 = vmul.f32 %v1218_v15, %v531_v40 }
 0x2a0   :  { %v337_v3 = vmul.f32 0.5, %v336_v24 }
 0x2a1   :  { %v688_v39 = vmul.f32 0.5, %v687_v27  ;;  %v536_v41 = vsel %vm1267_vm8, %v1218_v15, %v532_v2 }
 0x2a2   :  { %v338_v45 = vsub.f32 1.5, %v337_v3 }
 0x2a3   :  { %v798_v31 = vpop.eup %797  ;;  %v689_v53 = vsub.f32 1.5, %v688_v39 }
 0x2a4   :  { %v800_v44 = vpop.eup %799  ;;  %v339_v63 = vmul.f32 %v794_v30, %v338_v45  ;;  %v696_v58 = vmul.f32 %v798_v31, %v1234_v4  ;;  %vm702_vm9 = vweird.f32 %v798_v31 }
 0x2a5   :  { %v690_v48 = vmul.f32 %v796_v8, %v689_v53  ;;  %v345_v37 = vmul.f32 %v800_v44, %v1236_v11  ;;  %vm351_vm10 = vweird.f32 %v800_v44  ;;  %vm703_vm13 = vmor %vm701_vm11, %vm702_vm9  ;;  %v512_v11 = vmul.f32 %v1188_v1, %v1069_v50 }
 0x2a6   :  { %v343_v19 = vsel %vm342_vm0, %v794_v30, %v339_v63  ;;  %v697_v23 = vmul.f32 %v798_v31, %v696_v58  ;;  %vm352_vm15 = vmor %vm350_vm14, %vm351_vm10  ;;  %v593_v58 = vpop.permute.xlu0 %592 }
 0x2a7   :  { %v374_v24 = vmul.f32 %v343_v19, %v1137_v10  ;;  %v694_v22 = vsel %vm693_vm5, %v796_v8, %v690_v48  ;;  %v346_v27 = vmul.f32 %v800_v44, %v345_v37 }
 0x2a8   :  { %v725_v30 = vmul.f32 %v694_v22, %v1130_v5  ;;  %v698_v3 = vmul.f32 0.5, %v697_v23  ;;  %v207_v5 = vmul.f32 %v185_v54, %v1080_v0 }
 0x2a9   :  { %v378_v10 = vmul.f32 %v374_v24, %v981_v33  ;;  %v347_v8 = vmul.f32 0.5, %v346_v27  ;;  %v558_v33 = vmul.f32 %v536_v41, %v1088_v14 }
 0x2aa   :  { %v729_v61 = vmul.f32 %v725_v30, %v1035_v6  ;;  %v699_v40 = vsub.f32 1.5, %v698_v3  ;;  %v231_v14 = vmul.f32 %v1011_v55, %v207_v5 }
 0x2ab   :  { %v382_v60 = vadd.f32 %v378_v10, %v1013_v56  ;;  %v348_v45 = vsub.f32 1.5, %v347_v8  ;;  %v161_v10 = vmul.f32 %v1184_v47, %v1059_v29 }
 0x2ac   :  { %v733_v53 = vadd.f32 %v729_v61, %v1055_v20  ;;  %v700_v25 = vmul.f32 %v798_v31, %v699_v40  ;;  %v255_v2 = vadd.f32 %v985_v38, %v231_v14 }
 0x2ad   :  { %v737_v15 = vsel %vm114_vm2, %v254_v36, %v382_v60  ;;  %v349_v6 = vmul.f32 %v800_v44, %v348_v45  ;;  %v511_v36 = vmul.f32 %v1186_v52, %v1069_v50  ;;  %v1324_v5 = vadd.f32 1e-05, %v161_v10 }
 0x2ae   :  { %750 = vst [vmem:[%s1410_s10] sm:$0xff] %v737_v15  ;;  %v704_v56 = vsel %vm703_vm13, %v798_v31, %v700_v25  ;;  %v741_v20 = vsel %vm416_vm1, %v605_v59, %v733_v53  ;;  %v582_v31 = vmul.f32 %v1051_v16, %v558_v33 }
 0x2af   :  { %v726_v0 = vmul.f32 %v704_v56, %v1125_v62  ;;  %v353_v4 = vsel %vm352_vm15, %v800_v44, %v349_v6  ;;  %v746_v63 = vsel %vm745_vm12, %v741_v20, 0.0 }
 0x2b0   :  { %v375_v9 = vmul.f32 %v353_v4, %v1145_v13  ;;  %751 = vst [vmem:[%s1410_s10 + $0x8] sm:$0xff] %v746_v63  ;;  %v606_v44 = vadd.f32 %v593_v58, %v582_v31  ;;  %v516_v13 = vadd.f32 1e-05, %v512_v11 }
 0x2b1   :  { %v730_v48 = vmul.f32 %v726_v0, %v1051_v16 }
 0x2b2   :  { %v379_v62 = vmul.f32 %v375_v9, %v1011_v55  ;;  %801 = vrsqrt.f32 %v516_v13  ;;  %vm553_vm3 = vweird.f32 %v516_v13 }
 0x2b3   :  { %v734_v37 = vadd.f32 %v730_v48, %v593_v58 }
 0x2b4   :  { %v383_v19 = vadd.f32 %v379_v62, %v985_v38  ;;  %v160_v38 = vmul.f32 %v1182_v46, %v1059_v29  ;;  %v1320_v46 = vadd.f32 1e-05, %v511_v36 }
 0x2b5   :  { %v742_v23 = vsel %vm416_vm1, %v606_v44, %v734_v37 }
 0x2b6   :  { %v738_v17 = vsel %vm114_vm2, %v255_v2, %v383_v19  ;;  %v747_v24 = vsel %vm745_vm12, %v742_v23, 0.0  ;;  %v1313_v30 = vadd.f32 1e-05, %v160_v38 }
 0x2b7   :  { %752 = vst [vmem:[%s1410_s10 + $0x10] sm:$0xff] %v738_v17 }
 0x2b8   :  { %753 = vst [vmem:[%s1410_s10 + $0x18] sm:$0xff] %v747_v24  ;;  %v802_v55 = vpop.eup %801  ;;  %vm192_vm9 = vweird.f32 %v1313_v30 }
 0x2b9   :  { %v548_v16 = vmul.f32 %v802_v55, %v516_v13  ;;  %vm554_vm0 = vweird.f32 %v802_v55 }
 0x2ba   :  { %vm555_vm4 = vmor %vm553_vm3, %vm554_vm0  ;;  %vm543_vm3 = vweird.f32 %v1320_v46 }
 0x2bb   :  { %v549_v27 = vmul.f32 %v802_v55, %v548_v16 }
 0x2bd   :  { %v550_v3 = vmul.f32 0.5, %v549_v27 }
 0x2bf   :  { %v551_v59 = vsub.f32 1.5, %v550_v3 }
 0x2c1   :  { %v552_v61 = vmul.f32 %v802_v55, %v551_v59 }
 0x2c3   :  { %v556_v47 = vsel %vm555_vm4, %v802_v55, %v552_v61 }
 0x2c4   :  { %v676_v1 = vpop.xlane.xlu2 %675  ;;  %v560_v25 = vmul.f32 %v556_v47, %v1106_v32 }
 0x2c5   :  { %v680_v22 = vmul.f32 %v676_v1, %v1069_v50 }
 0x2c6   :  { %v584_v14 = vmul.f32 %v1037_v7, %v560_v25 }
 0x2c7   :  { %v684_v54 = vadd.f32 1e-05, %v680_v22 }
 0x2c9   :  { %803 = vrsqrt.f32 %v684_v54  ;;  %vm721_vm6 = vweird.f32 %v684_v54 }
 0x2ca   :  { %805 = vrsqrt.f32 %v1313_v30 }
 0x2cb   :  { %807 = vrsqrt.f32 %v1320_v46 }
 0x2cc   :  { %809 = vrsqrt.f32 %v1324_v5  ;;  %v603_v4 = vpop.permute.xlu2 %602 }
 0x2cd   :  { %v608_v31 = vadd.f32 %v603_v4, %v584_v14 }
 0x2cf   :  { %v804_v39 = vpop.eup %803 }
 0x2d0   :  { %v716_v8 = vmul.f32 %v804_v39, %v684_v54  ;;  %v1322_v40 = vpop.eup %805  ;;  %vm722_vm5 = vweird.f32 %v804_v39 }
 0x2d1   :  { %v187_v52 = vmul.f32 %v1322_v40, %v1313_v30  ;;  %vm723_vm7 = vmor %vm721_vm6, %vm722_vm5  ;;  %v1332_v56 = vpop.eup %807  ;;  %vm193_vm8 = vweird.f32 %v1322_v40  ;;  %vm202_vm5 = vweird.f32 %v1324_v5 }
 0x2d2   :  { %v717_v41 = vmul.f32 %v804_v39, %v716_v8  ;;  %v1336_v63 = vpop.eup %809  ;;  %v538_v32 = vmul.f32 %v1332_v56, %v1320_v46  ;;  %vm194_vm10 = vmor %vm192_vm9, %vm193_vm8  ;;  %vm544_vm14 = vweird.f32 %v1332_v56 }
 0x2d3   :  { %v188_v33 = vmul.f32 %v1322_v40, %v187_v52  ;;  %vm203_vm15 = vweird.f32 %v1336_v63  ;;  %vm1365_vm4 = vmor %vm543_vm3, %vm544_vm14 }
 0x2d4   :  { %v718_v60 = vmul.f32 0.5, %v717_v41  ;;  %v539_v19 = vmul.f32 %v1332_v56, %v538_v32  ;;  %vm204_vm6 = vmor %vm202_vm5, %vm203_vm15 }
 0x2d5   :  { %v189_v11 = vmul.f32 0.5, %v188_v33 }
 0x2d6   :  { %v719_v45 = vsub.f32 1.5, %v718_v60  ;;  %v540_v38 = vmul.f32 0.5, %v539_v19 }
 0x2d7   :  { %v190_v44 = vsub.f32 1.5, %v189_v11 }
 0x2d8   :  { %v720_v53 = vmul.f32 %v804_v39, %v719_v45  ;;  %v541_v36 = vsub.f32 1.5, %v540_v38 }
 0x2d9   :  { %v191_v16 = vmul.f32 %v1322_v40, %v190_v44 }
 0x2da   :  { %v724_v15 = vsel %vm723_vm7, %v804_v39, %v720_v53  ;;  %v322_v6 = vpop.xlane.xlu0 %321  ;;  %v542_v30 = vmul.f32 %v1332_v56, %v541_v36 }
 0x2db   :  { %v728_v20 = vmul.f32 %v724_v15, %v1164_v34  ;;  %v328_v0 = vmul.f32 %v322_v6, %v1059_v29  ;;  %v197_v34 = vmul.f32 %v1336_v63, %v1324_v5 }
 0x2dc   :  { %v546_v6 = vsel %vm1365_vm4, %v1332_v56, %v542_v30 }
 0x2dd   :  { %v732_v58 = vmul.f32 %v728_v20, %v1037_v7  ;;  %v332_v9 = vadd.f32 1e-05, %v328_v0  ;;  %v198_v13 = vmul.f32 %v1336_v63, %v197_v34  ;;  %v559_v56 = vmul.f32 %v546_v6, %v1092_v18 }
 0x2df   :  { %v736_v48 = vadd.f32 %v732_v58, %v603_v4  ;;  %811 = vrsqrt.f32 %v332_v9  ;;  %v199_v27 = vmul.f32 0.5, %v198_v13  ;;  %vm360_vm13 = vweird.f32 %v332_v9 }
 0x2e1   :  { %v744_v62 = vsel %vm416_vm1, %v608_v31, %v736_v48  ;;  %v200_v59 = vsub.f32 1.5, %v199_v27  ;;  %v583_v31 = vmul.f32 %v1044_v12, %v559_v56 }
 0x2e2   :  { %v749_v37 = vsel %vm745_vm12, %v744_v62, 0.0  ;;  %v673_v2 = vpop.xlane.xlu0 %672 }
 0x2e3   :  { %757 = vst [vmem:[%s1410_s10 + $0x38] sm:$0xff] %v749_v37  ;;  %v679_v7 = vmul.f32 %v673_v2, %v1069_v50  ;;  %v195_v50 = vsel %vm194_vm10, %v1322_v40, %v191_v16  ;;  %v201_v40 = vmul.f32 %v1336_v63, %v200_v59 }
 0x2e4   :  { %v325_v23 = vpop.xlane.xlu1 %324  ;;  %v208_v10 = vmul.f32 %v195_v50, %v1102_v26 }
 0x2e5   :  { %v812_v17 = vpop.eup %811  ;;  %v683_v24 = vadd.f32 1e-05, %v679_v7  ;;  %v329_v55 = vmul.f32 %v325_v23, %v1059_v29  ;;  %v205_v46 = vsel %vm204_vm6, %v1336_v63, %v201_v40 }
 0x2e6   :  { %v355_v1 = vmul.f32 %v812_v17, %v332_v9  ;;  %vm361_vm11 = vweird.f32 %v812_v17  ;;  %v232_v26 = vmul.f32 %v991_v42, %v208_v10  ;;  %v209_v58 = vmul.f32 %v205_v46, %v1116_v43 }
 0x2e7   :  { %813 = vrsqrt.f32 %v683_v24  ;;  %v333_v22 = vadd.f32 1e-05, %v329_v55  ;;  %vm362_vm0 = vmor %vm360_vm13, %vm361_vm11  ;;  %vm711_vm8 = vweird.f32 %v683_v24 }
 0x2e8   :  { %v356_v54 = vmul.f32 %v812_v17, %v355_v1  ;;  %v256_v0 = vadd.f32 %v999_v49, %v232_v26  ;;  %v233_v32 = vmul.f32 %v983_v35, %v209_v58 }
 0x2e9   :  { %815 = vrsqrt.f32 %v333_v22  ;;  %vm370_vm11 = vweird.f32 %v333_v22 }
 0x2ea   :  { %v357_v3 = vmul.f32 0.5, %v356_v54  ;;  %v257_v37 = vadd.f32 %v1015_v57, %v233_v32 }
 0x2ec   :  { %v358_v29 = vsub.f32 1.5, %v357_v3 }
 0x2ed   :  { %v814_v39 = vpop.eup %813 }
 0x2ee   :  { %v359_v8 = vmul.f32 %v812_v17, %v358_v29  ;;  %v706_v41 = vmul.f32 %v814_v39, %v683_v24  ;;  %vm712_vm7 = vweird.f32 %v814_v39 }
 0x2ef   :  { %v816_v61 = vpop.eup %815  ;;  %vm713_vm10 = vmor %vm711_vm8, %vm712_vm7 }
 0x2f0   :  { %v363_v60 = vsel %vm362_vm0, %v812_v17, %v359_v8  ;;  %v707_v52 = vmul.f32 %v814_v39, %v706_v41  ;;  %v365_v45 = vmul.f32 %v816_v61, %v333_v22  ;;  %vm371_vm9 = vweird.f32 %v816_v61 }
 0x2f1   :  { %v376_v47 = vmul.f32 %v363_v60, %v1160_v28  ;;  %vm372_vm13 = vmor %vm370_vm11, %vm371_vm9 }
 0x2f2   :  { %v708_v25 = vmul.f32 0.5, %v707_v52  ;;  %v366_v33 = vmul.f32 %v816_v61, %v365_v45 }
 0x2f3   :  { %v380_v15 = vmul.f32 %v376_v47, %v991_v42 }
 0x2f4   :  { %v709_v20 = vsub.f32 1.5, %v708_v25  ;;  %v367_v28 = vmul.f32 0.5, %v366_v33 }
 0x2f5   :  { %v384_v4 = vadd.f32 %v380_v15, %v999_v49 }
 0x2f6   :  { %v368_v5 = vsub.f32 1.5, %v367_v28  ;;  %v710_v14 = vmul.f32 %v814_v39, %v709_v20 }
 0x2f7   :  { %v739_v42 = vsel %vm114_vm2, %v256_v0, %v384_v4 }
 0x2f8   :  { %754 = vst [vmem:[%s1410_s10 + $0x20] sm:$0xff] %v739_v42  ;;  %v369_v63 = vmul.f32 %v816_v61, %v368_v5  ;;  %v714_v9 = vsel %vm713_vm10, %v814_v39, %v710_v14 }
 0x2f9   :  { %v727_v49 = vmul.f32 %v714_v9, %v1153_v21 }
 0x2fa   :  { %v373_v11 = vsel %vm372_vm13, %v816_v61, %v369_v63 }
 0x2fb   :  { %v377_v43 = vmul.f32 %v373_v11, %v1174_v51  ;;  %v731_v48 = vmul.f32 %v727_v49, %v1044_v12 }
 0x2fc   :  { %v598_v18 = vpop.permute.xlu1 %597 }
 0x2fd   :  { %v381_v34 = vmul.f32 %v377_v43, %v983_v35  ;;  %v607_v62 = vadd.f32 %v598_v18, %v583_v31  ;;  %v735_v44 = vadd.f32 %v731_v48, %v598_v18 }
 0x2ff   :  { %v385_v2 = vadd.f32 %v381_v34, %v1015_v57  ;;  %v743_v21 = vsel %vm416_vm1, %v607_v62, %v735_v44 }
 0x300   :  { %v748_v19 = vsel %vm745_vm12, %v743_v21, 0.0 }
 0x301   :  { %v740_v7 = vsel %vm114_vm2, %v257_v37, %v385_v2  ;;  %755 = vst [vmem:[%s1410_s10 + $0x28] sm:$0xff] %v748_v19 }
 0x302   :  { %756 = vst [vmem:[%s1410_s10 + $0x30] sm:$0xff] %v740_v7 }

</bundles_post_ra>
